<compile_context>
chip_gen: v5e
topology: v5e:2x2
jax: 0.10.0
libtpu: 0.0.40
codegen_flags: <defaults>
</compile_context>

<pallas_src>
import numpy as np
import jax
import jax.numpy as jnp
from jax import lax
from jax.experimental import pallas as pl
from jax.experimental.pallas import tpu as pltpu

KSIZE = 7
PAD = 3


# ---------------------------------------------------------------------------
# Kernel 1: SpatialAttention + global avg/max pooling (one image per grid step)
# ---------------------------------------------------------------------------
def _sa_pool_kernel(x_ref, cmat_ref, out_ref):
    """x_ref:    (HW, C)       one image, channels-last (C on the lane axis)
    cmat_ref:    (HW, 2*HW)    dense 7x7-conv operator [avg-part | max-part]
    out_ref:     (2, C)        row 0 = global avg pool, row 1 = global max pool
    """
    x = x_ref[...]                                       # (HW, C) f32

    # channel-wise mean / max -> (HW, 1): lane reduction over C (XLU)
    avg_c = jnp.mean(x, axis=1, keepdims=True)
    max_c = jnp.max(x, axis=1, keepdims=True)
    s = jnp.concatenate([avg_c, max_c], axis=0)          # (2*HW, 1)

    # 7x7 conv (2 -> 1, pad=3, no bias) as ONE small MXU matmul.
    conv = jnp.dot(cmat_ref[...], s, preferred_element_type=jnp.float32)
    att = jax.nn.sigmoid(conv)                           # (HW, 1)

    # gate + global pooling: lane-dense VPU work over all HW*C elements,
    # single full-tile (lane-dense) store.
    gated = x * att                                      # (HW, C)
    out_ref[...] = jnp.concatenate(
        [jnp.mean(gated, axis=0, keepdims=True),         # avg pool
         jnp.max(gated, axis=0, keepdims=True)],         # max pool
        axis=0)


def _build_conv_matrix(conv_w, H, W):
    """Dense (HW, 2*HW) operator equivalent to Conv2d(2,1,7,padding=3,bias=False)
    applied to the stacked [channel-mean; channel-max] maps (PyTorch
    cross-correlation).  conv[q] = sum_p m_avg[q,p]*avg[p] + m_max[q,p]*max[p]."""
    HW = H * W
    q = jnp.arange(HW)
    ho, wo = q // W, q % W
    dh = ho[None, :] - ho[:, None] + PAD                 # (HW, HW)
    dw = wo[None, :] - wo[:, None] + PAD
    valid = (dh >= 0) & (dh < KSIZE) & (dw >= 0) & (dw < KSIZE)
    dhc = jnp.clip(dh, 0, KSIZE - 1)
    dwc = jnp.clip(dw, 0, KSIZE - 1)
    w = conv_w.astype(jnp.float32)                       # (1, 2, 7, 7)
    m_avg = jnp.where(valid, w[0, 0][dhc, dwc], 0.0)     # (HW, HW)
    m_max = jnp.where(valid, w[0, 1][dhc, dwc], 0.0)
    return jnp.concatenate([m_avg, m_max], axis=1)       # (HW, 2*HW)


# ---------------------------------------------------------------------------
# Kernel 2: attention_block (SE-gate) + fc_linear (Linear -> BN1d -> ReLU)
# ---------------------------------------------------------------------------
def _mlp_fc_kernel(feat_ref, w1_ref, w2_ref, wfc_ref, bfc_ref, g_ref, b_ref,
                   out_ref, a_ref):
    """Tiled over the fc output (Cout) axis.

    feat_ref: (B, F) f32        pooled features (resident across the grid)
    w1_ref:   (F, F//16) bf16   attention_block weights (resident)
    w2_ref:   (F//16, F) bf16
    wfc_ref:  (F, tn) bf16      fc weight tile for this grid step (streamed)
    bfc/g/b:  (1, tn) f32       fc bias, BN gamma, BN beta tiles
    out_ref:  (B, tn) f32
    a_ref:    (B, F) f32 VMEM scratch: SE-gated features, computed once at j==0
    """
    @pl.when(pl.program_id(0) == 0)
    def _():
        x = feat_ref[...]
        h = jnp.maximum(
            jnp.dot(x.astype(jnp.bfloat16), w1_ref[...],
                    preferred_element_type=jnp.float32), 0.0)
        y = jax.nn.sigmoid(
            jnp.dot(h.astype(jnp.bfloat16), w2_ref[...],
                    preferred_element_type=jnp.float32))
        a_ref[...] = x * y                               # x * sigmoid(MLP(x))

    a = a_ref[...].astype(jnp.bfloat16)
    z = jnp.dot(a, wfc_ref[...],
                preferred_element_type=jnp.float32) + bfc_ref[...]
    # BatchNorm1d, training-mode batch statistics (full batch per tile).
    mu = jnp.mean(z, axis=0, keepdims=True)
    var = jnp.mean((z - mu) ** 2, axis=0, keepdims=True)
    zhat = (z - mu) * lax.rsqrt(var + 1e-5)
    out_ref[...] = jnp.maximum(g_ref[...] * zhat + b_ref[...], 0.0)


def _cout_tile(n, cap=512):
    if n % 128 != 0:
        return n
    t = 128
    while t * 2 <= cap and n % (t * 2) == 0:
        t *= 2
    return t


# ---------------------------------------------------------------------------
# Wrapper
# ---------------------------------------------------------------------------
def spatial_avgmax_attention(x, params):
    B, C, H, W = x.shape
    HW = H * W
    F = 2 * C
    Cout = params["wfc"].shape[1]
    hid = params["w1"].shape[1]

    # --- kernel 1: spatial attention + global pooling ----------------------
    # Channels-last so C maps to the 128-lane axis inside the kernel.
    x_cl = jnp.transpose(x, (0, 2, 3, 1)).reshape(B, HW, C)
    cmat = _build_conv_matrix(params["conv_w"], H, W)    # (HW, 2*HW)

    pooled = pl.pallas_call(
        _sa_pool_kernel,
        out_shape=jax.ShapeDtypeStruct((B, 2, C), jnp.float32),
        grid=(B,),
        in_specs=[
            pl.BlockSpec((None, HW, C), lambda b: (b, 0, 0)),
            pl.BlockSpec((HW, 2 * HW), lambda b: (0, 0)),     # stays resident
        ],
        out_specs=pl.BlockSpec((None, 2, C), lambda b: (b, 0, 0)),
        compiler_params=pltpu.CompilerParams(
            dimension_semantics=("parallel",)),               # megacore-able
    )(x_cl, cmat)
    feat = pooled.reshape(B, F)                               # [avg | max]

    # --- kernel 2: attention_block + fc_linear ------------------------------
    w1 = params["w1"].astype(jnp.bfloat16)
    w2 = params["w2"].astype(jnp.bfloat16)
    wfc = params["wfc"].astype(jnp.bfloat16)

    tn = _cout_tile(Cout)
    out = pl.pallas_call(
        _mlp_fc_kernel,
        out_shape=jax.ShapeDtypeStruct((B, Cout), jnp.float32),
        grid=(Cout // tn,),
        in_specs=[
            pl.BlockSpec((B, F), lambda j: (0, 0)),
            pl.BlockSpec((F, hid), lambda j: (0, 0)),
            pl.BlockSpec((hid, F), lambda j: (0, 0)),
            pl.BlockSpec((F, tn), lambda j: (0, j)),
            pl.BlockSpec((1, tn), lambda j: (0, j)),
            pl.BlockSpec((1, tn), lambda j: (0, j)),
            pl.BlockSpec((1, tn), lambda j: (0, j)),
        ],
        out_specs=pl.BlockSpec((B, tn), lambda j: (0, j)),
        scratch_shapes=[pltpu.VMEM((B, F), jnp.float32)],
        # 'arbitrary': the gated-feature scratch written at j==0 is reused by
        # every later Cout tile (and BN needs the full batch), so this axis
        # must stay sequential on one core.
        compiler_params=pltpu.CompilerParams(
            dimension_semantics=("arbitrary",)),
    )(feat, w1, w2, wfc, params["bfc"], params["gamma"], params["beta"])
    return out


# ---------------------------------------------------------------------------
# Params / reference
# ---------------------------------------------------------------------------
def init_params(key, C, reduction=16):
    """Synthetic init mirroring the PyTorch module shapes (full size C=2048)."""
    F = 2 * C
    hid = max(F // reduction, 1)
    Cout = C
    k0, k1, k2, k3, k4 = jax.random.split(key, 5)
    conv_w = jax.random.normal(k0, (1, 2, KSIZE, KSIZE), jnp.float32) * np.sqrt(
        2.0 / (2 * KSIZE * KSIZE))
    w1 = jax.random.normal(k1, (F, hid), jnp.float32) * np.sqrt(1.0 / F)
    w2 = jax.random.normal(k2, (hid, F), jnp.float32) * np.sqrt(1.0 / hid)
    wfc = jax.random.normal(k3, (F, Cout), jnp.float32) * np.sqrt(2.0 / Cout)
    bfc = jnp.zeros((1, Cout), jnp.float32)
    gamma = 1.0 + 0.02 * jax.random.normal(k4, (1, Cout), jnp.float32)
    beta = jnp.zeros((1, Cout), jnp.float32)
    return dict(conv_w=conv_w, w1=w1, w2=w2, wfc=wfc, bfc=bfc,
                gamma=gamma, beta=beta)


def reference_forward(x, p):
    """Pure-JAX reference (training-mode BN, bf16 matmul operands like the kernel)."""
    def b16(a):
        return a.astype(jnp.bfloat16).astype(jnp.float32)

    avg = jnp.mean(x, axis=1, keepdims=True)
    mx = jnp.max(x, axis=1, keepdims=True)
    s = jnp.concatenate([avg, mx], axis=1)
    conv = lax.conv_general_dilated(
        s, p["conv_w"], (1, 1), [(PAD, PAD), (PAD, PAD)],
        dimension_numbers=("NCHW", "OIHW", "NCHW"),
        precision=lax.Precision.HIGHEST)
    gated = jax.nn.sigmoid(conv) * x
    feat = jnp.concatenate([jnp.mean(gated, axis=(2, 3)),
                            jnp.max(gated, axis=(2, 3))], axis=1)
    w1, w2, wfc = b16(p["w1"]), b16(p["w2"]), b16(p["wfc"])
    h = jnp.maximum(jnp.dot(b16(feat), w1, precision=lax.Precision.HIGHEST), 0.0)
    y = jax.nn.sigmoid(jnp.dot(b16(h), w2, precision=lax.Precision.HIGHEST))
    a = feat * y
    z = jnp.dot(b16(a), wfc, precision=lax.Precision.HIGHEST) + p["bfc"]
    mu = jnp.mean(z, axis=0, keepdims=True)
    var = jnp.mean((z - mu) ** 2, axis=0, keepdims=True)
    return jnp.maximum(p["gamma"] * (z - mu) * lax.rsqrt(var + 1e-5) + p["beta"],
                       0.0)


if __name__ == "__main__":
    # Small shapes consistent with the module: (B, C, H, W) in; pooled 2C feeds
    # attention_block(2C) and fc_linear(2C -> C).  Full-size module is C=2048.
    B, C, H, W = 4, 32, 16, 16
    key = jax.random.PRNGKey(0)
    kx, kp = jax.random.split(key)
    x = jax.random.normal(kx, (B, C, H, W), jnp.float32)
    params = init_params(kp, C)

    out = jax.block_until_ready(spatial_avgmax_attention(x, params))
    ref = jax.block_until_ready(reference_forward(x, params))

    assert out.shape == (B, C), out.shape
    np.testing.assert_allclose(np.asarray(out), np.asarray(ref),
                               rtol=5e-3, atol=5e-3)
    print("KERNEL_OK")
</pallas_src>

<mosaic_0001>
module attributes {stable_mosaic.version = 11 : i64} {
  func.func @_sa_pool_kernel(%arg0: i32, %arg1: memref<1x256x32xf32, #tpu.memory_space<vmem>>, %arg2: memref<256x512xf32, #tpu.memory_space<vmem>>, %arg3: memref<1x2x32xf32, #tpu.memory_space<vmem>>) attributes {dimension_semantics = [#tpu.dimension_semantics<parallel>], iteration_bounds = array<i64: 4>, scalar_prefetch = 0 : i64, scratch_operands = 0 : i64, tpu.core_type = #tpu.core_type<tc>, window_params = [{transform_indices = @transform_0, window_bounds = array<i64: 1, 256, 32>}, {pipeline_mode = #tpu.pipeline_mode<synchronous>, transform_indices = @transform_1, window_bounds = array<i64: 256, 512>}, {transform_indices = @transform_2, window_bounds = array<i64: 1, 2, 32>}]} {
    %c0 = arith.constant 0 : index
    %c0_0 = arith.constant 0 : index
    %c0_1 = arith.constant 0 : index
    %0 = vector.load %arg1[%c0, %c0_0, %c0_1] : memref<1x256x32xf32, #tpu.memory_space<vmem>>, vector<1x256x32xf32>
    %1 = vector.shape_cast %0 : vector<1x256x32xf32> to vector<256x32xf32>
    %cst = arith.constant dense<0.000000e+00> : vector<256xf32>
    %2 = vector.multi_reduction <add>, %1, %cst [1] : vector<256x32xf32> to vector<256xf32>
    %3 = vector.shape_cast %2 : vector<256xf32> to vector<256x1xf32>
    %cst_2 = arith.constant 3.200000e+01 : f32
    %4 = vector.broadcast %cst_2 : f32 to vector<256x1xf32>
    %5 = arith.divf %3, %4 : vector<256x1xf32>
    %cst_3 = arith.constant dense<0xFF800000> : vector<256xf32>
    %6 = vector.multi_reduction <maximumf>, %1, %cst_3 [1] : vector<256x32xf32> to vector<256xf32>
    %7 = vector.shape_cast %6 : vector<256xf32> to vector<256x1xf32>
    %8 = tpu.concatenate %5, %7 in 0 : vector<256x1xf32>, vector<256x1xf32> -> vector<512x1xf32>
    %c0_4 = arith.constant 0 : index
    %c0_5 = arith.constant 0 : index
    %9 = vector.load %arg2[%c0_4, %c0_5] : memref<256x512xf32, #tpu.memory_space<vmem>>, vector<256x512xf32>
    %cst_6 = arith.constant dense<0.000000e+00> : vector<256x1xf32>
    %10 = tpu.matmul %9, %8, %cst_6 {dimension_numbers = #tpu.dot_dimension_numbers<[1], [0], [0], [1], [0, 0, 1, 1], [], []>} : vector<256x512xf32>, vector<512x1xf32>, vector<256x1xf32> -> vector<256x1xf32>
    %11 = arith.negf %10 : vector<256x1xf32>
    %12 = math.exp %11 : vector<256x1xf32>
    %cst_7 = arith.constant 1.000000e+00 : f32
    %13 = vector.broadcast %cst_7 : f32 to vector<256x1xf32>
    %14 = arith.addf %13, %12 : vector<256x1xf32>
    %15 = arith.divf %13, %14 : vector<256x1xf32>
    %16 = vector.broadcast %15 : vector<256x1xf32> to vector<256x32xf32>
    %17 = arith.mulf %1, %16 : vector<256x32xf32>
    %cst_8 = arith.constant dense<0.000000e+00> : vector<32xf32>
    %18 = vector.multi_reduction <add>, %17, %cst_8 [0] : vector<256x32xf32> to vector<32xf32>
    %19 = vector.shape_cast %18 : vector<32xf32> to vector<1x32xf32>
    %cst_9 = arith.constant 2.560000e+02 : f32
    %20 = vector.broadcast %cst_9 : f32 to vector<1x32xf32>
    %21 = arith.divf %19, %20 : vector<1x32xf32>
    %cst_10 = arith.constant dense<0xFF800000> : vector<32xf32>
    %22 = vector.multi_reduction <maximumf>, %17, %cst_10 [0] : vector<256x32xf32> to vector<32xf32>
    %23 = vector.shape_cast %22 : vector<32xf32> to vector<1x32xf32>
    %24 = tpu.concatenate %21, %23 in 0 : vector<1x32xf32>, vector<1x32xf32> -> vector<2x32xf32>
    %c0_11 = arith.constant 0 : index
    %c0_12 = arith.constant 0 : index
    %c0_13 = arith.constant 0 : index
    %25 = vector.load %arg3[%c0_11, %c0_12, %c0_13] : memref<1x2x32xf32, #tpu.memory_space<vmem>>, vector<1x2x32xf32>
    %26 = vector.shape_cast %25 : vector<1x2x32xf32> to vector<2x32xf32>
    %27 = vector.shape_cast %24 : vector<2x32xf32> to vector<1x2x32xf32>
    tpu.vector_store %arg3[%c0_11, %c0_12, %c0_13], %27 {strides = array<i32>} : memref<1x2x32xf32, #tpu.memory_space<vmem>>, vector<1x2x32xf32>,
    return
  }
  func.func @transform_0(%arg0: i32) -> (i32, i32, i32) {
    %c0_i32 = arith.constant 0 : i32
    %c0_i32_0 = arith.constant 0 : i32
    %c0_i32_1 = arith.constant 0 : i32
    return %arg0, %c0_i32, %c0_i32_0 : i32, i32, i32
  }
  func.func @transform_1(%arg0: i32) -> (i32, i32) {
    %c0_i32 = arith.constant 0 : i32
    %c0_i32_0 = arith.constant 0 : i32
    %c0_i32_1 = arith.constant 0 : i32
    return %c0_i32, %c0_i32_0 : i32, i32
  }
  func.func @transform_2(%arg0: i32) -> (i32, i32, i32) {
    %c0_i32 = arith.constant 0 : i32
    %c0_i32_0 = arith.constant 0 : i32
    %c0_i32_1 = arith.constant 0 : i32
    return %arg0, %c0_i32, %c0_i32_0 : i32, i32, i32
  }
}

</mosaic_0001>

<bundles_post_ra>
// kernel: tpu_custom_call.1
= control target key start
LH: loop header
LB: loop body
LE: loop exit
PB: predicated region body
PF: predicated region fallthrough
CT: control target
= control target key end

     0   :  { %7 = vsyncpa [#allocation3], 0  ;;  %s3197_s0 = inlined_call_operand.vmem [shape: f32[4,256,32], index: 0, kind: input, shape index: {}]   ;;  %s3198_s1 = inlined_call_operand.vmem [shape: f32[256,512], index: 1, kind: input, shape index: {}]   ;;  %s3199_s2 = inlined_call_operand.hbm [shape: f32[4,2,32], index: 2, kind: output, shape index: {}]  }
   0x1   :  { %9 = vsyncpa [#allocation3 + $0x1], 0  ;;  %s2346_s9 = smov 0   ;;  %s2348_s10 = smov 0  }
   0x2   :  { %s2350_s11 = smov 0   ;;  %s2352_s12 = smov 0  }
   0x3 LB: > { %s2367_s13 = sadd.s32 4294967295, %s2326_s12   ;;  %s2011_s14 = sadd.s32 4294967294, %s2326_s12   ;;  %s2326_s12 = sphi %s2352_s12, %s3205_s12   ;;  %s2322_s11 = sphi %s2350_s11, %s3204_s11   ;;  %s2318_s10 = sphi %s2348_s10, %s3203_s10   ;;  %s2314_s9 = sphi %s2346_s9, %s3202_s9  }
   0x4   : > { %s2371_s15 = sadd.s32 1, %s2326_s12   ;;  %s69_s16 = sadd.s32 1, %s2322_s11 }
   0x5   : > { %s66_s17 = ssub.s32 %s2326_s12, %s2371_s15  ;;  %p79_p0 = scmp.ne.s32.totalorder %s2322_s11, %s2318_s10 }
   0x6   : > { %p67_p1 = scmp.eq.s32.totalorder %s66_s17, 0  ;;  %p80_p2 = scmp.eq.s32.totalorder %s2367_s13, 3 }
   0x7   : > { %p85_p3 = scmp.ne.s32.totalorder %s2318_s10, %s2314_s9  ;;  %p86_p4 = scmp.eq.s32.totalorder %s2011_s14, 3 }
   0x8   : > { %s2382_s18 = scalar_select %p67_p1, %s2322_s11, %s69_s16  }
   0x9   : > { %p2384_p5 = por %p80_p2, %p79_p0  ;;  %p2388_p6 = por %p86_p4, %p85_p3 }
   0xa   : > { %p2014_p7 = scmp.ge.s32.totalorder %s2326_s12, 1  ;;  %p115_p8 = scmp.lt.s32.totalorder %s2326_s12, 5 }
   0xc   : > { %p116_p9 = pnand %p2014_p7, %p115_p8 }
   0xd   : > { %p137_p10 = scmp.lt.s32.totalorder (!%p116_p9), %s2367_s13, 3  ;;  %s134_s30 = sand.u32 (!%p116_p9), 1, %s2318_s10  }
   0xe   : > { %119 = sbr.rel (%p116_p9) target bundleno = 852 (0x354), region = 28  ;;  %s2051_s3 = sshll.u32 (!%p116_p9), %s2367_s13, 1 }
   0xf   : > { %s1947_s6 = scalar_lea.hbm (!%p116_p9), %s3199_s2, %s2051_s3  ;;  %s2284_s23 = scalar_lea.hbm (!%p116_p9), %s3199_s2, 8 }
  0x10   : > { %s1951_s14 = sshll.u32 (!%p116_p9), %s1947_s6, 4  ;;  %s1952_s14 = int_to_ptr.hbm [resolvable:$true] %s1951_s14 }
  0x11   : > { %s2278_s16 = sshra.s32 (!%p116_p9), %s1952_s14, 4  ;;  %s2279_s16 = int_to_ptr.hbm [resolvable:$true] %s2278_s16 }
  0x12   : > { %s2280_s17 = scalar_lea.hbm (!%p116_p9), %s2279_s16, 2  ;;  %p2285_p0 = scmp.lt.s32.totalorder (!%p116_p9), %s2279_s16, %s3199_s2 }
  0x13   : > { %s138_s21 = scalar_select %p137_p10, %s2367_s13, 3  ;;  %vm174_vm0 = vcmask 261120   ;;  %v2328_v55 = vmov 32.0  }
  0x14   : > { %2100 = vrcp.f32 %v2328_v55  ;;  %s1937_s13 = scalar_lea.sflag [#allocation3], %s134_s30  ;;  %p2281_p11 = scmp.ne.s32.totalorder %s2279_s16, %s2280_s17 }
  0x15   : > { %s2054_s22 = sshll.u32 %s138_s21, 8  ;;  %p2286_p1 = scmp.lt.s32.totalorder %s2284_s23, %s2280_s17 }
  0x16   : > { %s2399_s25 = scalar_lea.vmem %s3197_s0, %s2054_s22  ;;  %p2282_p12 = pnand %p2281_p11, %p2384_p5 }
  0x17   : > { %v157_v0 = vld [vmem:[%s2399_s25 + $0x78] sm:$0xff]  ;;  %v156_v5 = vld [vmem:[%s2399_s25 + $0x70] sm:$0xff]  ;;  %v155_v10 = vld [vmem:[%s2399_s25 + $0x68] sm:$0xff]  ;;  %p2287_p2 = por %p2286_p1, %p2285_p0 }
  0x18   : > { %v173_v1 = vld [vmem:[%s2399_s25 + $0xf8] sm:$0xff]  ;;  %v355_v2 = vsel %vm174_vm0, %v157_v0, -inf  ;;  %v220_v6 = vsel %vm174_vm0, %v157_v0, 0.0  ;;  %v217_v7 = vsel %vm174_vm0, %v156_v5, 0.0  ;;  %v352_v8 = vsel %vm174_vm0, %v156_v5, -inf  ;;  %v172_v9 = vld [vmem:[%s2399_s25 + $0xf0] sm:$0xff]  ;;  %p2283_p13 = pneg %p2282_p12 }
  0x19   : > { %v403_v3 = vsel %vm174_vm0, %v173_v1, -inf  ;;  %v268_v4 = vsel %vm174_vm0, %v173_v1, 0.0  ;;  %356 = vmax.xlane.f32.xlu0 %v355_v2  ;;  %v265_v11 = vsel %vm174_vm0, %v172_v9, 0.0  ;;  %v400_v12 = vsel %vm174_vm0, %v172_v9, -inf  ;;  %v154_v14 = vld [vmem:[%s2399_s25 + $0x60] sm:$0xff]  ;;  %v171_v15 = vld [vmem:[%s2399_s25 + $0xe8] sm:$0xff] }
  0x1a   : > { %404 = vmax.xlane.f32.xlu2 %v403_v3  ;;  %269 = vadd.xlane.f32.xlu1 %v268_v4  ;;  %v349_v13 = vsel %vm174_vm0, %v155_v10, -inf  ;;  %v214_v16 = vsel %vm174_vm0, %v155_v10, 0.0  ;;  %v346_v17 = vsel %vm174_vm0, %v154_v14, -inf  ;;  %v262_v18 = vsel %vm174_vm0, %v171_v15, 0.0  ;;  %v170_v19 = vld [vmem:[%s2399_s25 + $0xe0] sm:$0xff]  ;;  %v153_v23 = vld [vmem:[%s2399_s25 + $0x58] sm:$0xff]  ;;  %v2101_v60 = vpop.eup %2100  ;;  %p2288_p3 = pnand %p2287_p2, %p2283_p13 }
  0x1b   : > { %v397_v20 = vsel %vm174_vm0, %v171_v15, -inf  ;;  %v259_v21 = vsel %vm174_vm0, %v170_v19, 0.0  ;;  %v211_v22 = vsel %vm174_vm0, %v154_v14, 0.0  ;;  %v343_v24 = vsel %vm174_vm0, %v153_v23, -inf  ;;  %v169_v27 = vld [vmem:[%s2399_s25 + $0xd8] sm:$0xff]  ;;  %v152_v28 = vld [vmem:[%s2399_s25 + $0x50] sm:$0xff] }
  0x1c   : > { %v208_v25 = vsel %vm174_vm0, %v153_v23, 0.0  ;;  %v394_v26 = vsel %vm174_vm0, %v170_v19, -inf  ;;  %v256_v29 = vsel %vm174_vm0, %v169_v27, 0.0  ;;  %v391_v30 = vsel %vm174_vm0, %v169_v27, -inf  ;;  %v151_v32 = vld [vmem:[%s2399_s25 + $0x48] sm:$0xff]  ;;  %v168_v33 = vld [vmem:[%s2399_s25 + $0xd0] sm:$0xff] }
  0x1d   : > { %v340_v31 = vsel %vm174_vm0, %v152_v28, -inf  ;;  %v205_v34 = vsel %vm174_vm0, %v152_v28, 0.0  ;;  %v337_v35 = vsel %vm174_vm0, %v151_v32, -inf  ;;  %v253_v36 = vsel %vm174_vm0, %v168_v33, 0.0  ;;  %v167_v37 = vld [vmem:[%s2399_s25 + $0xc8] sm:$0xff]  ;;  %v150_v41 = vld [vmem:[%s2399_s25 + $0x40] sm:$0xff] }
  0x1e   : > { %v388_v38 = vsel %vm174_vm0, %v168_v33, -inf  ;;  %v250_v39 = vsel %vm174_vm0, %v167_v37, 0.0  ;;  %v202_v40 = vsel %vm174_vm0, %v151_v32, 0.0  ;;  %v334_v42 = vsel %vm174_vm0, %v150_v41, -inf  ;;  %v166_v45 = vld [vmem:[%s2399_s25 + $0xc0] sm:$0xff]  ;;  %v149_v46 = vld [vmem:[%s2399_s25 + $0x38] sm:$0xff] }
  0x1f   : > { %v199_v43 = vsel %vm174_vm0, %v150_v41, 0.0  ;;  %v385_v44 = vsel %vm174_vm0, %v167_v37, -inf  ;;  %v247_v47 = vsel %vm174_vm0, %v166_v45, 0.0  ;;  %v382_v48 = vsel %vm174_vm0, %v166_v45, -inf  ;;  %v148_v50 = vld [vmem:[%s2399_s25 + $0x30] sm:$0xff]  ;;  %v165_v51 = vld [vmem:[%s2399_s25 + $0xb8] sm:$0xff] }
  0x20   : > { %v331_v49 = vsel %vm174_vm0, %v149_v46, -inf  ;;  %v196_v52 = vsel %vm174_vm0, %v149_v46, 0.0  ;;  %v328_v53 = vsel %vm174_vm0, %v148_v50, -inf  ;;  %v244_v54 = vsel %vm174_vm0, %v165_v51, 0.0  ;;  %v164_v56 = vld [vmem:[%s2399_s25 + $0xb0] sm:$0xff]  ;;  %v147_v61 = vld [vmem:[%s2399_s25 + $0x28] sm:$0xff] }
  0x21   : > { %221 = vadd.xlane.f32.xlu0 %v220_v6  ;;  %v379_v57 = vsel %vm174_vm0, %v165_v51, -inf  ;;  %v241_v58 = vsel %vm174_vm0, %v164_v56, 0.0  ;;  %v193_v59 = vsel %vm174_vm0, %v148_v50, 0.0  ;;  %v272_v62 = vmul.f32 32.0, %v2101_v60  ;;  %v163_v3 = vld [vmem:[%s2399_s25 + $0xa8] sm:$0xff]  ;;  %v146_v5 = vld [vmem:[%s2399_s25 + $0x20] sm:$0xff] }
  0x22   : > { %218 = vadd.xlane.f32.xlu2 %v217_v7  ;;  %353 = vmax.xlane.f32.xlu1 %v352_v8  ;;  %v325_v63 = vsel %vm174_vm0, %v147_v61, -inf  ;;  %v190_v0 = vsel %vm174_vm0, %v147_v61, 0.0  ;;  %v376_v1 = vsel %vm174_vm0, %v164_v56, -inf  ;;  %v238_v6 = vsel %vm174_vm0, %v163_v3, 0.0  ;;  %v162_v14 = vld [vmem:[%s2399_s25 + $0xa0] sm:$0xff]  ;;  %v160_v37 = vld [vmem:[%s2399_s25 + $0x90] sm:$0xff] }
  0x23   : > { %v273_v2 = vsub.f32 1.0, %v272_v62  ;;  %v373_v7 = vsel %vm174_vm0, %v163_v3, -inf  ;;  %v322_v8 = vsel %vm174_vm0, %v146_v5, -inf  ;;  %vm276_vm1 = vweird.f32 %v2101_v60  ;;  %v142_v50 = vld [vmem:[%s2399_s25] sm:$0xff] }
  0x24   : > { %v235_v19 = vsel %vm174_vm0, %v162_v14, 0.0  ;;  %v364_v45 = vsel %vm174_vm0, %v160_v37, -inf  ;;  %v310_v56 = vsel %vm174_vm0, %v142_v50, -inf }
  0x25   : > { %v274_v4 = vmul.f32 %v2101_v60, %v273_v2 }
  0x27   : > { %v275_v9 = vadd.f32 %v2101_v60, %v274_v4 }
  0x29   : > { %266 = vadd.xlane.f32.xlu0 %v265_v11  ;;  %v2469_v10 = vsel %vm276_vm1, %v2101_v60, %v275_v9  ;;  %v145_v11 = vld [vmem:[%s2399_s25 + $0x18] sm:$0xff] }
  0x2a   : > { %401 = vmax.xlane.f32.xlu2 %v400_v12  ;;  %350 = vmax.xlane.f32.xlu1 %v349_v13  ;;  %v184_v28 = vsel %vm174_vm0, %v145_v11, 0.0 }
  0x31   : > { %215 = vadd.xlane.f32.xlu0 %v214_v16  ;;  %v187_v16 = vsel %vm174_vm0, %v146_v5, 0.0 }
  0x32   : > { %347 = vmax.xlane.f32.xlu2 %v346_v17  ;;  %263 = vadd.xlane.f32.xlu1 %v262_v18  ;;  %v319_v18 = vsel %vm174_vm0, %v145_v11, -inf }
  0x39   : > { %398 = vmax.xlane.f32.xlu0 %v397_v20 }
  0x3a   : > { %260 = vadd.xlane.f32.xlu2 %v259_v21  ;;  %212 = vadd.xlane.f32.xlu1 %v211_v22  ;;  %v161_v22 = vld [vmem:[%s2399_s25 + $0x98] sm:$0xff] }
  0x3b   : > { %v232_v27 = vsel %vm174_vm0, %v161_v22, 0.0 }
  0x41   : > { %344 = vmax.xlane.f32.xlu0 %v343_v24 }
  0x42   : > { %209 = vadd.xlane.f32.xlu2 %v208_v25  ;;  %395 = vmax.xlane.f32.xlu1 %v394_v26  ;;  %v370_v26 = vsel %vm174_vm0, %v162_v14, -inf }
  0x49   : > { %257 = vadd.xlane.f32.xlu0 %v256_v29  ;;  %v144_v29 = vld [vmem:[%s2399_s25 + $0x10] sm:$0xff] }
  0x4a   : > { %392 = vmax.xlane.f32.xlu2 %v391_v30  ;;  %341 = vmax.xlane.f32.xlu1 %v340_v31 }
  0x51   : > { %206 = vadd.xlane.f32.xlu0 %v205_v34  ;;  %v316_v34 = vsel %vm174_vm0, %v144_v29, -inf }
  0x52   : > { %338 = vmax.xlane.f32.xlu2 %v337_v35  ;;  %254 = vadd.xlane.f32.xlu1 %v253_v36  ;;  %v367_v35 = vsel %vm174_vm0, %v161_v22, -inf  ;;  %v181_v36 = vsel %vm174_vm0, %v144_v29, 0.0 }
  0x59   : > { %389 = vmax.xlane.f32.xlu0 %v388_v38 }
  0x5a   : > { %251 = vadd.xlane.f32.xlu2 %v250_v39  ;;  %203 = vadd.xlane.f32.xlu1 %v202_v40  ;;  %v143_v40 = vld [vmem:[%s2399_s25 + $0x8] sm:$0xff] }
  0x5b   : > { %v313_v46 = vsel %vm174_vm0, %v143_v40, -inf }
  0x61   : > { %335 = vmax.xlane.f32.xlu0 %v334_v42 }
  0x62   : > { %200 = vadd.xlane.f32.xlu2 %v199_v43  ;;  %386 = vmax.xlane.f32.xlu1 %v385_v44  ;;  %v229_v43 = vsel %vm174_vm0, %v160_v37, 0.0 }
  0x69   : > { %248 = vadd.xlane.f32.xlu0 %v247_v47 }
  0x6a   : > { %383 = vmax.xlane.f32.xlu2 %v382_v48  ;;  %332 = vmax.xlane.f32.xlu1 %v331_v49  ;;  %v159_v49 = vld [vmem:[%s2399_s25 + $0x88] sm:$0xff] }
  0x6b   : > { %v226_v55 = vsel %vm174_vm0, %v159_v49, 0.0  ;;  %v361_v62 = vsel %vm174_vm0, %v159_v49, -inf }
  0x71   : > { %197 = vadd.xlane.f32.xlu0 %v196_v52 }
  0x72   : > { %329 = vmax.xlane.f32.xlu2 %v328_v53  ;;  %245 = vadd.xlane.f32.xlu1 %v244_v54  ;;  %v178_v53 = vsel %vm174_vm0, %v143_v40, 0.0 }
  0x79   : > { %380 = vmax.xlane.f32.xlu0 %v379_v57 }
  0x7a   : > { %242 = vadd.xlane.f32.xlu2 %v241_v58  ;;  %194 = vadd.xlane.f32.xlu1 %v193_v59  ;;  %v158_v59 = vld [vmem:[%s2399_s25 + $0x80] sm:$0xff] }
  0x7b   : > { %v358_v5 = vsel %vm174_vm0, %v158_v59, -inf }
  0x81   : > { %326 = vmax.xlane.f32.xlu0 %v325_v63  ;;  %v223_v63 = vsel %vm174_vm0, %v158_v59, 0.0 }
  0x82   : > { %191 = vadd.xlane.f32.xlu2 %v190_v0  ;;  %377 = vmax.xlane.f32.xlu1 %v376_v1  ;;  %v175_v0 = vsel %vm174_vm0, %v142_v50, 0.0 }
  0x89   : > { %239 = vadd.xlane.f32.xlu0 %v238_v6 }
  0x8a   : > { %374 = vmax.xlane.f32.xlu2 %v373_v7  ;;  %323 = vmax.xlane.f32.xlu1 %v322_v8 }
  0x8c   : > { %v357_v12 = vpop.xlane.xlu0 %356 }
  0x8d   : > { %v405_v13 = vpop.xlane.xlu2 %404  ;;  %760 = vmatpush.msra.mxu2 %v357_v12  ;;  %v270_v15 = vpop.xlane.xlu1 %269 }
  0x8e   : > { %873 = vmatpush.msra.mxu3 %v405_v13  ;;  %v309_v17 = vmul.f32 %v2469_v10, %v270_v15 }
  0x90   : > { %647 = vmatpush.msra.mxu1 %v309_v17 }
  0x91   : > { %188 = vadd.xlane.f32.xlu0 %v187_v16 }
  0x92   : > { %320 = vmax.xlane.f32.xlu2 %v319_v18  ;;  %236 = vadd.xlane.f32.xlu1 %v235_v19 }
  0x94   : > { %v222_v20 = vpop.xlane.xlu0 %221 }
  0x95   : > { %v219_v21 = vpop.xlane.xlu2 %218  ;;  %v293_v23 = vmul.f32 %v2469_v10, %v222_v20  ;;  %v354_v24 = vpop.xlane.xlu1 %353 }
  0x96   : > { %v292_v25 = vmul.f32 %v2469_v10, %v219_v21  ;;  %761 = vmatpush.msra.mxu2 %v354_v24 }
  0x97   : > { %534 = vmatpush.msra.mxu0 %v293_v23 }
  0x99   : > { %371 = vmax.xlane.f32.xlu0 %v370_v26  ;;  %535 = vmatpush.msra.mxu0 %v292_v25 }
  0x9a   : > { %233 = vadd.xlane.f32.xlu2 %v232_v27  ;;  %185 = vadd.xlane.f32.xlu1 %v184_v28 }
  0x9c   : > { %v267_v30 = vpop.xlane.xlu0 %266 }
  0x9d   : > { %v402_v31 = vpop.xlane.xlu2 %401  ;;  %v308_v32 = vmul.f32 %v2469_v10, %v267_v30  ;;  %v351_v33 = vpop.xlane.xlu1 %350 }
  0x9e   : > { %874 = vmatpush.msra.mxu3 %v402_v31  ;;  %762 = vmatpush.msra.mxu2 %v351_v33 }
  0x9f   : > { %648 = vmatpush.msra.mxu1 %v308_v32 }
  0xa1   : > { %317 = vmax.xlane.f32.xlu0 %v316_v34 }
  0xa2   : > { %368 = vmax.xlane.f32.xlu1 %v367_v35  ;;  %182 = vadd.xlane.f32.xlu2 %v181_v36 }
  0xa4   : > { %v216_v38 = vpop.xlane.xlu0 %215 }
  0xa5   : > { %v348_v39 = vpop.xlane.xlu2 %347  ;;  %v291_v41 = vmul.f32 %v2469_v10, %v216_v38  ;;  %v264_v42 = vpop.xlane.xlu1 %263 }
  0xa6   : > { %763 = vmatpush.msra.mxu2 %v348_v39  ;;  %v307_v44 = vmul.f32 %v2469_v10, %v264_v42 }
  0xa7   : > { %536 = vmatpush.msra.mxu0 %v291_v41 }
  0xa8   : > { %649 = vmatpush.msra.mxu1 %v307_v44 }
  0xa9   : > { %230 = vadd.xlane.f32.xlu0 %v229_v43 }
  0xaa   : > { %365 = vmax.xlane.f32.xlu2 %v364_v45  ;;  %314 = vmax.xlane.f32.xlu1 %v313_v46 }
  0xac   : > { %v399_v47 = vpop.xlane.xlu0 %398 }
  0xad   : > { %v261_v48 = vpop.xlane.xlu2 %260  ;;  %875 = vmatpush.msra.mxu3 %v399_v47  ;;  %v213_v52 = vpop.xlane.xlu1 %212 }
  0xae   : > { %v306_v51 = vmul.f32 %v2469_v10, %v261_v48  ;;  %v290_v54 = vmul.f32 %v2469_v10, %v213_v52 }
  0xb0   : > { %650 = vmatpush.msra.mxu1 %v306_v51  ;;  %537 = vmatpush.msra.mxu0 %v290_v54 }
  0xb1   : > { %179 = vadd.xlane.f32.xlu0 %v178_v53 }
  0xb2   : > { %227 = vadd.xlane.f32.xlu1 %v226_v55  ;;  %311 = vmax.xlane.f32.xlu2 %v310_v56 }
  0xb4   : > { %v345_v57 = vpop.xlane.xlu0 %344 }
  0xb5   : > { %v210_v58 = vpop.xlane.xlu2 %209  ;;  %764 = vmatpush.msra.mxu2 %v345_v57  ;;  %v396_v60 = vpop.xlane.xlu1 %395 }
  0xb6   : > { %v289_v61 = vmul.f32 %v2469_v10, %v210_v58  ;;  %876 = vmatpush.msra.mxu3 %v396_v60 }
  0xb8   : > { %538 = vmatpush.msra.mxu0 %v289_v61 }
  0xb9   : > { %362 = vmax.xlane.f32.xlu0 %v361_v62  ;;  %v408_v62 = vld [vmem:[%s3198_s1 + $0x10] sm:$0xff] }
  0xba   : > { %224 = vadd.xlane.f32.xlu2 %v223_v63  ;;  %176 = vadd.xlane.f32.xlu1 %v175_v0 }
  0xbc   : > { %v258_v1 = vpop.xlane.xlu0 %257 }
  0xbd   : > { %v393_v2 = vpop.xlane.xlu2 %392  ;;  %v305_v3 = vmul.f32 %v2469_v10, %v258_v1  ;;  %v342_v4 = vpop.xlane.xlu1 %341 }
  0xbe   : > { %877 = vmatpush.msra.mxu3 %v393_v2  ;;  %765 = vmatpush.msra.mxu2 %v342_v4  ;;  %v412_v4 = vld [vmem:[%s3198_s1 + $0x30] sm:$0xff] }
  0xbf   : > { %651 = vmatpush.msra.mxu1 %v305_v3 }
  0xc1   : > { %359 = vmax.xlane.f32.xlu0 %v358_v5 }
  0xc4   : > { %v207_v6 = vpop.xlane.xlu0 %206 }
  0xc5   : > { %v339_v7 = vpop.xlane.xlu2 %338  ;;  %v288_v8 = vmul.f32 %v2469_v10, %v207_v6  ;;  %v255_v9 = vpop.xlane.xlu1 %254 }
  0xc6   : > { %766 = vmatpush.msra.mxu2 %v339_v7  ;;  %v304_v11 = vmul.f32 %v2469_v10, %v255_v9  ;;  %v406_v9 = vld [vmem:[%s3198_s1] sm:$0xff] }
  0xc7   : > { %539 = vmatpush.msra.mxu0 %v288_v8 }
  0xc8   : > { %652 = vmatpush.msra.mxu1 %v304_v11  ;;  %v407_v11 = vld [vmem:[%s3198_s1 + $0x8] sm:$0xff] }
  0xcc   : > { %v390_v12 = vpop.xlane.xlu0 %389 }
  0xcd   : > { %v252_v13 = vpop.xlane.xlu2 %251  ;;  %878 = vmatpush.msra.mxu3 %v390_v12  ;;  %v204_v15 = vpop.xlane.xlu1 %203  ;;  %v409_v12 = vld [vmem:[%s3198_s1 + $0x18] sm:$0xff] }
  0xce   : > { %v303_v14 = vmul.f32 %v2469_v10, %v252_v13  ;;  %v287_v16 = vmul.f32 %v2469_v10, %v204_v15  ;;  %v411_v15 = vld [vmem:[%s3198_s1 + $0x28] sm:$0xff] }
  0xd0   : > { %653 = vmatpush.msra.mxu1 %v303_v14  ;;  %540 = vmatpush.msra.mxu0 %v287_v16  ;;  %v410_v14 = vld [vmem:[%s3198_s1 + $0x20] sm:$0xff]  ;;  %v413_v16 = vld [vmem:[%s3198_s1 + $0x38] sm:$0xff] }
  0xd4   : > { %v336_v17 = vpop.xlane.xlu0 %335 }
  0xd5   : > { %v201_v18 = vpop.xlane.xlu2 %200  ;;  %767 = vmatpush.msra.mxu2 %v336_v17  ;;  %v387_v19 = vpop.xlane.xlu1 %386  ;;  %v420_v17 = vld [vmem:[%s3198_s1 + $0x70] sm:$0xff] }
  0xd6   : > { %v286_v20 = vmul.f32 %v2469_v10, %v201_v18  ;;  %879 = vmatpush.msra.mxu3 %v387_v19  ;;  %v414_v18 = vld [vmem:[%s3198_s1 + $0x40] sm:$0xff]  ;;  %v415_v19 = vld [vmem:[%s3198_s1 + $0x48] sm:$0xff] }
  0xd8   : > { %541 = vmatpush.msra.mxu0 %v286_v20  ;;  %v417_v20 = vld [vmem:[%s3198_s1 + $0x58] sm:$0xff] }
  0xdc   : > { %v249_v21 = vpop.xlane.xlu0 %248 }
  0xdd   : > { %v384_v22 = vpop.xlane.xlu2 %383  ;;  %v302_v23 = vmul.f32 %v2469_v10, %v249_v21  ;;  %v333_v24 = vpop.xlane.xlu1 %332  ;;  %v424_v21 = vld [vmem:[%s3198_s1 + $0x90] sm:$0xff] }
  0xde   : > { %880 = vmatpush.msra.mxu3 %v384_v22  ;;  %768 = vmatpush.msra.mxu2 %v333_v24  ;;  %v418_v22 = vld [vmem:[%s3198_s1 + $0x60] sm:$0xff]  ;;  %v421_v24 = vld [vmem:[%s3198_s1 + $0x78] sm:$0xff] }
  0xdf   : > { %654 = vmatpush.msra.mxu1 %v302_v23  ;;  %v419_v23 = vld [vmem:[%s3198_s1 + $0x68] sm:$0xff] }
  0xe4   : > { %v198_v25 = vpop.xlane.xlu0 %197 }
  0xe5   : > { %v330_v26 = vpop.xlane.xlu2 %329  ;;  %v285_v27 = vmul.f32 %v2469_v10, %v198_v25  ;;  %v246_v28 = vpop.xlane.xlu1 %245  ;;  %v428_v25 = vld [vmem:[%s3198_s1 + $0xb0] sm:$0xff] }
  0xe6   : > { %769 = vmatpush.msra.mxu2 %v330_v26  ;;  %v301_v29 = vmul.f32 %v2469_v10, %v246_v28  ;;  %v422_v26 = vld [vmem:[%s3198_s1 + $0x80] sm:$0xff]  ;;  %v425_v28 = vld [vmem:[%s3198_s1 + $0x98] sm:$0xff] }
  0xe7   : > { %542 = vmatpush.msra.mxu0 %v285_v27  ;;  %v423_v27 = vld [vmem:[%s3198_s1 + $0x88] sm:$0xff] }
  0xe8   : > { %655 = vmatpush.msra.mxu1 %v301_v29  ;;  %v432_v29 = vld [vmem:[%s3198_s1 + $0xd0] sm:$0xff] }
  0xec   : > { %v381_v30 = vpop.xlane.xlu0 %380 }
  0xed   : > { %v243_v31 = vpop.xlane.xlu2 %242  ;;  %881 = vmatpush.msra.mxu3 %v381_v30  ;;  %v195_v33 = vpop.xlane.xlu1 %194  ;;  %v426_v30 = vld [vmem:[%s3198_s1 + $0xa0] sm:$0xff] }
  0xee   : > { %v300_v32 = vmul.f32 %v2469_v10, %v243_v31  ;;  %v284_v34 = vmul.f32 %v2469_v10, %v195_v33  ;;  %v427_v31 = vld [vmem:[%s3198_s1 + $0xa8] sm:$0xff]  ;;  %v436_v33 = vld [vmem:[%s3198_s1 + $0xf0] sm:$0xff] }
  0xf0   : > { %656 = vmatpush.msra.mxu1 %v300_v32  ;;  %543 = vmatpush.msra.mxu0 %v284_v34  ;;  %v429_v32 = vld [vmem:[%s3198_s1 + $0xb8] sm:$0xff]  ;;  %v430_v34 = vld [vmem:[%s3198_s1 + $0xc0] sm:$0xff] }
  0xf4   : > { %v327_v35 = vpop.xlane.xlu0 %326 }
  0xf5   : > { %v192_v36 = vpop.xlane.xlu2 %191  ;;  %770 = vmatpush.msra.mxu2 %v327_v35  ;;  %v378_v37 = vpop.xlane.xlu1 %377  ;;  %v431_v35 = vld [vmem:[%s3198_s1 + $0xc8] sm:$0xff] }
  0xf6   : > { %v283_v38 = vmul.f32 %v2469_v10, %v192_v36  ;;  %882 = vmatpush.msra.mxu3 %v378_v37  ;;  %v433_v36 = vld [vmem:[%s3198_s1 + $0xd8] sm:$0xff]  ;;  %v440_v37 = vld [vmem:[%s3198_s1 + $0x110] sm:$0xff] }
  0xf8   : > { %544 = vmatpush.msra.mxu0 %v283_v38  ;;  %v434_v38 = vld [vmem:[%s3198_s1 + $0xe0] sm:$0xff] }
  0xfc   : > { %v240_v39 = vpop.xlane.xlu0 %239 }
  0xfd   : > { %v375_v40 = vpop.xlane.xlu2 %374  ;;  %v299_v41 = vmul.f32 %v2469_v10, %v240_v39  ;;  %v324_v42 = vpop.xlane.xlu1 %323  ;;  %v435_v39 = vld [vmem:[%s3198_s1 + $0xe8] sm:$0xff] }
  0xfe   : > { %883 = vmatpush.msra.mxu3 %v375_v40  ;;  %771 = vmatpush.msra.mxu2 %v324_v42  ;;  %v437_v40 = vld [vmem:[%s3198_s1 + $0xf8] sm:$0xff]  ;;  %v438_v42 = vld [vmem:[%s3198_s1 + $0x100] sm:$0xff] }
  0xff   : > { %657 = vmatpush.msra.mxu1 %v299_v41  ;;  %v444_v41 = vld [vmem:[%s3198_s1 + $0x130] sm:$0xff] }
 0x104   : > { %v189_v43 = vpop.xlane.xlu0 %188 }
 0x105   : > { %v321_v44 = vpop.xlane.xlu2 %320  ;;  %v282_v45 = vmul.f32 %v2469_v10, %v189_v43  ;;  %v237_v46 = vpop.xlane.xlu1 %236  ;;  %v439_v43 = vld [vmem:[%s3198_s1 + $0x108] sm:$0xff] }
 0x106   : > { %772 = vmatpush.msra.mxu2 %v321_v44  ;;  %v298_v47 = vmul.f32 %v2469_v10, %v237_v46  ;;  %v441_v44 = vld [vmem:[%s3198_s1 + $0x118] sm:$0xff]  ;;  %v442_v46 = vld [vmem:[%s3198_s1 + $0x120] sm:$0xff] }
 0x107   : > { %545 = vmatpush.msra.mxu0 %v282_v45  ;;  %v448_v45 = vld [vmem:[%s3198_s1 + $0x150] sm:$0xff] }
 0x108   : > { %658 = vmatpush.msra.mxu1 %v298_v47  ;;  %v443_v47 = vld [vmem:[%s3198_s1 + $0x128] sm:$0xff] }
 0x10c   : > { %v372_v48 = vpop.xlane.xlu0 %371 }
 0x10d   : > { %884 = vmatpush.msra.mxu3 %v372_v48  ;;  %v234_v49 = vpop.xlane.xlu2 %233  ;;  %v186_v50 = vpop.xlane.xlu1 %185  ;;  %v445_v48 = vld [vmem:[%s3198_s1 + $0x138] sm:$0xff] }
 0x10e   : > { %v297_v51 = vmul.f32 %v2469_v10, %v234_v49  ;;  %v281_v52 = vmul.f32 %v2469_v10, %v186_v50  ;;  %v452_v49 = vld [vmem:[%s3198_s1 + $0x170] sm:$0xff]  ;;  %v446_v50 = vld [vmem:[%s3198_s1 + $0x140] sm:$0xff] }
 0x110   : > { %546 = vmatpush.msra.mxu0 %v281_v52  ;;  %659 = vmatpush.msra.mxu1 %v297_v51  ;;  %v447_v51 = vld [vmem:[%s3198_s1 + $0x148] sm:$0xff]  ;;  %v449_v52 = vld [vmem:[%s3198_s1 + $0x158] sm:$0xff] }
 0x114   : > { %v318_v53 = vpop.xlane.xlu0 %317 }
 0x115   : > { %773 = vmatpush.msra.mxu2 %v318_v53  ;;  %v369_v54 = vpop.xlane.xlu1 %368  ;;  %v183_v55 = vpop.xlane.xlu2 %182  ;;  %v456_v53 = vld [vmem:[%s3198_s1 + $0x190] sm:$0xff] }
 0x116   : > { %v280_v56 = vmul.f32 %v2469_v10, %v183_v55  ;;  %885 = vmatpush.msra.mxu3 %v369_v54  ;;  %v450_v54 = vld [vmem:[%s3198_s1 + $0x160] sm:$0xff]  ;;  %v451_v55 = vld [vmem:[%s3198_s1 + $0x168] sm:$0xff] }
 0x118   : > { %547 = vmatpush.msra.mxu0 %v280_v56  ;;  %v453_v56 = vld [vmem:[%s3198_s1 + $0x178] sm:$0xff] }
 0x11c   : > { %v231_v57 = vpop.xlane.xlu0 %230 }
 0x11d   : > { %v296_v58 = vmul.f32 %v2469_v10, %v231_v57  ;;  %v366_v59 = vpop.xlane.xlu2 %365  ;;  %v315_v60 = vpop.xlane.xlu1 %314  ;;  %v460_v57 = vld [vmem:[%s3198_s1 + $0x1b0] sm:$0xff] }
 0x11e   : > { %774 = vmatpush.msra.mxu2 %v315_v60  ;;  %886 = vmatpush.msra.mxu3 %v366_v59  ;;  %v455_v59 = vld [vmem:[%s3198_s1 + $0x188] sm:$0xff]  ;;  %v457_v60 = vld [vmem:[%s3198_s1 + $0x198] sm:$0xff] }
 0x11f   : > { %660 = vmatpush.msra.mxu1 %v296_v58  ;;  %v454_v58 = vld [vmem:[%s3198_s1 + $0x180] sm:$0xff] }
 0x124   : > { %v180_v61 = vpop.xlane.xlu0 %179 }
 0x125   : > { %v279_v63 = vmul.f32 %v2469_v10, %v180_v61  ;;  %v228_v0 = vpop.xlane.xlu1 %227  ;;  %v312_v1 = vpop.xlane.xlu2 %311  ;;  %v464_v61 = vld [vmem:[%s3198_s1 + $0x1d0] sm:$0xff] }
 0x126   : > { %v295_v2 = vmul.f32 %v2469_v10, %v228_v0  ;;  %775 = vmatpush.msra.mxu2 %v312_v1  ;;  %v461_v0 = vld [vmem:[%s3198_s1 + $0x1b8] sm:$0xff]  ;;  %v468_v1 = vld [vmem:[%s3198_s1 + $0x1f0] sm:$0xff] }
 0x127   : > { %548 = vmatpush.msra.mxu0 %v279_v63  ;;  %776 = vmatmul.f32.vlgmr.msra.gmra.mxu2 %v408_v62  ;;  %v458_v62 = vld [vmem:[%s3198_s1 + $0x1a0] sm:$0xff]  ;;  %v459_v63 = vld [vmem:[%s3198_s1 + $0x1a8] sm:$0xff] }
 0x128   : > { %661 = vmatpush.msra.mxu1 %v295_v2  ;;  %v462_v2 = vld [vmem:[%s3198_s1 + $0x1c0] sm:$0xff] }
 0x12c   : > { %v363_v3 = vpop.xlane.xlu0 %362 }
 0x12d   : > { %887 = vmatpush.msra.mxu3 %v363_v3  ;;  %v225_v5 = vpop.xlane.xlu2 %224  ;;  %v177_v6 = vpop.xlane.xlu1 %176  ;;  %v463_v3 = vld [vmem:[%s3198_s1 + $0x1c8] sm:$0xff] }
 0x12e   : > { %v294_v7 = vmul.f32 %v2469_v10, %v225_v5  ;;  %v278_v8 = vmul.f32 %v2469_v10, %v177_v6  ;;  %v416_v10 = vld [vmem:[%s3198_s1 + $0x50] sm:$0xff]  ;;  %v466_v6 = vld [vmem:[%s3198_s1 + $0x1e0] sm:$0xff] }
 0x12f   : > { %779 = vmatmul.f32.gmra.mxu2 %v412_v4  ;;  %v465_v4 = vld [vmem:[%s3198_s1 + $0x1d8] sm:$0xff]  ;;  %v472_v5 = vld [vmem:[%s3198_s1 + $0x210] sm:$0xff] }
 0x130   : > { %549 = vmatpush.msra.mxu0 %v278_v8  ;;  %662 = vmatpush.msra.mxu1 %v294_v7  ;;  %v467_v7 = vld [vmem:[%s3198_s1 + $0x1e8] sm:$0xff] }
 0x131   : > { %550 = vmatmul.f32.vlgmr.msra.gmra.mxu0 %v406_v9  ;;  %663 = vmatmul.f32.vlgmr.msra.gmra.mxu1 %v407_v11  ;;  %v469_v9 = vld [vmem:[%s3198_s1 + $0x1f8] sm:$0xff]  ;;  %v476_v11 = vld [vmem:[%s3198_s1 + $0x230] sm:$0xff] }
 0x134   : > { %v360_v13 = vpop.xlane.xlu0 %359 }
 0x135   : > { %888 = vmatpush.msra.mxu3 %v360_v13 }
 0x136   : > { %889 = vmatmul.f32.vlgmr.msra.gmra.mxu3 %v409_v12 }
 0x137   : > { %782 = vmatmul.f32.gmra.mxu2 %v416_v10  ;;  %v470_v10 = vld [vmem:[%s3198_s1 + $0x200] sm:$0xff] }
 0x139   : > { %553 = vmatmul.f32.gmra.mxu0 %v410_v14  ;;  %666 = vmatmul.f32.gmra.mxu1 %v411_v15  ;;  %v471_v14 = vld [vmem:[%s3198_s1 + $0x208] sm:$0xff] }
 0x13e   : > { %892 = vmatmul.f32.gmra.mxu3 %v413_v16 }
 0x13f   : > { %785 = vmatmul.f32.gmra.mxu2 %v420_v17  ;;  %v473_v17 = vld [vmem:[%s3198_s1 + $0x218] sm:$0xff] }
 0x141   : > { %556 = vmatmul.f32.gmra.mxu0 %v414_v18  ;;  %669 = vmatmul.f32.gmra.mxu1 %v415_v19  ;;  %v480_v18 = vld [vmem:[%s3198_s1 + $0x250] sm:$0xff] }
 0x146   : > { %895 = vmatmul.f32.gmra.mxu3 %v417_v20 }
 0x147   : > { %788 = vmatmul.f32.gmra.mxu2 %v424_v21 }
 0x149   : > { %559 = vmatmul.f32.gmra.mxu0 %v418_v22  ;;  %672 = vmatmul.f32.gmra.mxu1 %v419_v23  ;;  %v474_v22 = vld [vmem:[%s3198_s1 + $0x220] sm:$0xff]  ;;  %v475_v23 = vld [vmem:[%s3198_s1 + $0x228] sm:$0xff] }
 0x14e   : > { %898 = vmatmul.f32.gmra.mxu3 %v421_v24  ;;  %v2329_v24 = vmov 0  }
 0x14f   : > { %791 = vmatmul.f32.gmra.mxu2 %v428_v25  ;;  %2097 = vset.pattern.permute.xlu1 %v2329_v24 }
 0x150   : > { %2098 = vset.pattern.permute.xlu2 %v2329_v24  ;;  %2099 = vset.pattern.permute.xlu0 %v2329_v24  ;;  %v491_v24 = vld [vmem:[%s3198_s1 + $0x2a8] sm:$0xff] }
 0x151   : > { %562 = vmatmul.f32.gmra.mxu0 %v422_v26  ;;  %675 = vmatmul.f32.gmra.mxu1 %v423_v27 }
 0x156   : > { %901 = vmatmul.f32.gmra.mxu3 %v425_v28 }
 0x157   : > { %794 = vmatmul.f32.gmra.mxu2 %v432_v29  ;;  %v477_v29 = vld [vmem:[%s3198_s1 + $0x238] sm:$0xff] }
 0x159   : > { %565 = vmatmul.f32.gmra.mxu0 %v426_v30  ;;  %678 = vmatmul.f32.gmra.mxu1 %v427_v31  ;;  %v484_v31 = vld [vmem:[%s3198_s1 + $0x270] sm:$0xff] }
 0x15e   : > { %904 = vmatmul.f32.gmra.mxu3 %v429_v32 }
 0x15f   : > { %797 = vmatmul.f32.gmra.mxu2 %v436_v33 }
 0x161   : > { %568 = vmatmul.f32.gmra.mxu0 %v430_v34  ;;  %681 = vmatmul.f32.gmra.mxu1 %v431_v35  ;;  %v478_v35 = vld [vmem:[%s3198_s1 + $0x240] sm:$0xff] }
 0x166   : > { %907 = vmatmul.f32.gmra.mxu3 %v433_v36  ;;  %v479_v36 = vld [vmem:[%s3198_s1 + $0x248] sm:$0xff] }
 0x167   : > { %800 = vmatmul.f32.gmra.mxu2 %v440_v37 }
 0x169   : > { %571 = vmatmul.f32.gmra.mxu0 %v434_v38  ;;  %684 = vmatmul.f32.gmra.mxu1 %v435_v39 }
 0x16e   : > { %910 = vmatmul.f32.gmra.mxu3 %v437_v40 }
 0x16f   : > { %803 = vmatmul.f32.gmra.mxu2 %v444_v41  ;;  %v481_v41 = vld [vmem:[%s3198_s1 + $0x258] sm:$0xff] }
 0x171   : > { %574 = vmatmul.f32.gmra.mxu0 %v438_v42  ;;  %687 = vmatmul.f32.gmra.mxu1 %v439_v43 }
 0x176   : > { %913 = vmatmul.f32.gmra.mxu3 %v441_v44  ;;  %v488_v44 = vld [vmem:[%s3198_s1 + $0x290] sm:$0xff] }
 0x177   : > { %806 = vmatmul.f32.gmra.mxu2 %v448_v45 }
 0x179   : > { %577 = vmatmul.f32.gmra.mxu0 %v442_v46  ;;  %690 = vmatmul.f32.gmra.mxu1 %v443_v47 }
 0x17e   : > { %916 = vmatmul.f32.gmra.mxu3 %v445_v48 }
 0x17f   : > { %809 = vmatmul.f32.gmra.mxu2 %v452_v49  ;;  %v482_v49 = vld [vmem:[%s3198_s1 + $0x260] sm:$0xff] }
 0x181   : > { %580 = vmatmul.f32.gmra.mxu0 %v446_v50  ;;  %693 = vmatmul.f32.gmra.mxu1 %v447_v51  ;;  %v483_v50 = vld [vmem:[%s3198_s1 + $0x268] sm:$0xff] }
 0x186   : > { %919 = vmatmul.f32.gmra.mxu3 %v449_v52 }
 0x187   : > { %812 = vmatmul.f32.gmra.mxu2 %v456_v53 }
 0x189   : > { %583 = vmatmul.f32.gmra.mxu0 %v450_v54  ;;  %696 = vmatmul.f32.gmra.mxu1 %v451_v55  ;;  %v485_v55 = vld [vmem:[%s3198_s1 + $0x278] sm:$0xff] }
 0x18e   : > { %922 = vmatmul.f32.gmra.mxu3 %v453_v56 }
 0x18f   : > { %815 = vmatmul.f32.gmra.mxu2 %v460_v57 }
 0x191   : > { %586 = vmatmul.f32.gmra.mxu0 %v454_v58  ;;  %699 = vmatmul.f32.gmra.mxu1 %v455_v59  ;;  %v492_v58 = vld [vmem:[%s3198_s1 + $0x2b0] sm:$0xff] }
 0x196   : > { %925 = vmatmul.f32.gmra.mxu3 %v457_v60 }
 0x197   : > { %818 = vmatmul.f32.gmra.mxu2 %v464_v61 }
 0x199   : > { %589 = vmatmul.f32.gmra.mxu0 %v458_v62  ;;  %702 = vmatmul.f32.gmra.mxu1 %v459_v63 }
 0x19e   : > { %928 = vmatmul.f32.gmra.mxu3 %v461_v0  ;;  %v486_v0 = vld [vmem:[%s3198_s1 + $0x280] sm:$0xff] }
 0x19f   : > { %821 = vmatmul.f32.gmra.mxu2 %v468_v1  ;;  %v487_v1 = vld [vmem:[%s3198_s1 + $0x288] sm:$0xff] }
 0x1a1   : > { %592 = vmatmul.f32.gmra.mxu0 %v462_v2  ;;  %705 = vmatmul.f32.gmra.mxu1 %v463_v3 }
 0x1a6   : > { %931 = vmatmul.f32.gmra.mxu3 %v465_v4 }
 0x1a7   : > { %824 = vmatmul.f32.gmra.mxu2 %v472_v5 }
 0x1a9   : > { %595 = vmatmul.f32.gmra.mxu0 %v466_v6  ;;  %708 = vmatmul.f32.gmra.mxu1 %v467_v7 }
 0x1aa   : > { %v777_v8 = vpop.f32.mrf.mxu2 }
 0x1ae   : > { %934 = vmatmul.f32.gmra.mxu3 %v469_v9  ;;  %v551_v12 = vpop.f32.mrf.mxu0  ;;  %v664_v13 = vpop.f32.mrf.mxu1 }
 0x1af   : > { %827 = vmatmul.f32.gmra.mxu2 %v476_v11  ;;  %v665_v15 = vadd.f32 %v664_v13, %v551_v12  ;;  %v489_v12 = vld [vmem:[%s3198_s1 + $0x298] sm:$0xff] }
 0x1b1   : > { %598 = vmatmul.f32.gmra.mxu0 %v470_v10  ;;  %711 = vmatmul.f32.gmra.mxu1 %v471_v14  ;;  %v778_v19 = vadd.f32 %v777_v8, %v665_v15  ;;  %v496_v15 = vld [vmem:[%s3198_s1 + $0x2d0] sm:$0xff] }
 0x1b2   : > { %v780_v16 = vpop.f32.mrf.mxu2 }
 0x1b6   : > { %937 = vmatmul.f32.gmra.mxu3 %v473_v17  ;;  %v554_v20 = vpop.f32.mrf.mxu0  ;;  %v667_v21 = vpop.f32.mrf.mxu1 }
 0x1b7   : > { %830 = vmatmul.f32.gmra.mxu2 %v480_v18  ;;  %v668_v27 = vadd.f32 %v667_v21, %v554_v20 }
 0x1b9   : > { %v890_v25 = vpop.f32.mrf.mxu3  ;;  %601 = vmatmul.f32.gmra.mxu0 %v474_v22  ;;  %714 = vmatmul.f32.gmra.mxu1 %v475_v23  ;;  %v781_v32 = vadd.f32 %v780_v16, %v668_v27  ;;  %v490_v23 = vld [vmem:[%s3198_s1 + $0x2a0] sm:$0xff] }
 0x1ba   : > { %v891_v26 = vadd.f32 %v890_v25, %v778_v19  ;;  %v783_v28 = vpop.f32.mrf.mxu2 }
 0x1bc   : > { %v2018_v30 = vmul.f32 -1.442695, %v891_v26 }
 0x1be   : > { %2102 = vpow2.f32 %v2018_v30  ;;  %940 = vmatmul.f32.gmra.mxu3 %v477_v29  ;;  %v557_v33 = vpop.f32.mrf.mxu0  ;;  %v670_v34 = vpop.f32.mrf.mxu1 }
 0x1bf   : > { %833 = vmatmul.f32.gmra.mxu2 %v484_v31  ;;  %v671_v39 = vadd.f32 %v670_v34, %v557_v33 }
 0x1c1   : > { %v893_v37 = vpop.f32.mrf.mxu3  ;;  %604 = vmatmul.f32.gmra.mxu0 %v478_v35  ;;  %717 = vmatmul.f32.gmra.mxu1 %v479_v36  ;;  %v784_v46 = vadd.f32 %v783_v28, %v671_v39  ;;  %v493_v35 = vld [vmem:[%s3198_s1 + $0x2b8] sm:$0xff]  ;;  %v500_v39 = vld [vmem:[%s3198_s1 + $0x2f0] sm:$0xff] }
 0x1c2   : > { %v894_v38 = vadd.f32 %v893_v37, %v781_v32  ;;  %v786_v40 = vpop.f32.mrf.mxu2 }
 0x1c4   : > { %v2103_v42 = vpop.eup %2102  ;;  %v2019_v43 = vmul.f32 -1.442695, %v894_v38 }
 0x1c5   : > { %v1082_v45 = vadd.f32 1.0, %v2103_v42 }
 0x1c6   : > { %2104 = vpow2.f32 %v2019_v43  ;;  %943 = vmatmul.f32.gmra.mxu3 %v481_v41  ;;  %v560_v47 = vpop.f32.mrf.mxu0  ;;  %v673_v48 = vpop.f32.mrf.mxu1 }
 0x1c7   : > { %2106 = vrcp.f32 %v1082_v45  ;;  %836 = vmatmul.f32.gmra.mxu2 %v488_v44  ;;  %v674_v53 = vadd.f32 %v673_v48, %v560_v47  ;;  %v1123_v5 = vand.u32 2147483647, %v1082_v45  ;;  %v1125_v6 = vand.u32 2147483648, %v1082_v45  ;;  %v494_v47 = vld [vmem:[%s3198_s1 + $0x2c0] sm:$0xff]  ;;  %v495_v48 = vld [vmem:[%s3198_s1 + $0x2c8] sm:$0xff] }
 0x1c8   : > { %vm1119_vm3 = vweird.f32 %v1082_v45 }
 0x1c9   : > { %v896_v51 = vpop.f32.mrf.mxu3  ;;  %607 = vmatmul.f32.gmra.mxu0 %v482_v49  ;;  %720 = vmatmul.f32.gmra.mxu1 %v483_v50  ;;  %v787_v61 = vadd.f32 %v786_v40, %v674_v53  ;;  %vm1124_vm5 = vcmp.eq.f32.partialorder %v1123_v5, 8.507059e+37  ;;  %v1126_v18 = vor.u32 1.1754944e-38, %v1125_v6 }
 0x1ca   : > { %v897_v52 = vadd.f32 %v896_v51, %v784_v46  ;;  %v789_v54 = vpop.f32.mrf.mxu2 }
 0x1cc   : > { %v2105_v56 = vpop.eup %2104  ;;  %v2020_v57 = vmul.f32 -1.442695, %v897_v52 }
 0x1cd   : > { %v2107_v59 = vpop.eup %2106  ;;  %v2777_v60 = vadd.f32 1.0, %v2105_v56 }
 0x1ce   : > { %2108 = vpow2.f32 %v2020_v57  ;;  %946 = vmatmul.f32.gmra.mxu3 %v485_v55  ;;  %v563_v62 = vpop.f32.mrf.mxu0  ;;  %v676_v63 = vpop.f32.mrf.mxu1  ;;  %v1115_v2 = vmul.f32 %v2107_v59, %v1082_v45  ;;  %vm1120_vm2 = vweird.f32 %v2107_v59 }
 0x1cf   : > { %2110 = vrcp.f32 %v2777_v60  ;;  %839 = vmatmul.f32.gmra.mxu2 %v492_v58  ;;  %v677_v8 = vadd.f32 %v676_v63, %v563_v62  ;;  %vm1121_vm4 = vmor %vm1119_vm3, %vm1120_vm2  ;;  %v1138_v29 = vand.u32 2147483647, %v2777_v60  ;;  %v1140_v30 = vand.u32 2147483648, %v2777_v60  ;;  %v504_v63 = vld [vmem:[%s3198_s1 + $0x310] sm:$0xff] }
 0x1d0   : > { %v1116_v3 = vsub.f32 1.0, %v1115_v2  ;;  %vm1134_vm7 = vweird.f32 %v2777_v60 }
 0x1d1   : > { %v899_v4 = vpop.f32.mrf.mxu3  ;;  %610 = vmatmul.f32.gmra.mxu0 %v486_v0  ;;  %723 = vmatmul.f32.gmra.mxu1 %v487_v1  ;;  %v790_v19 = vadd.f32 %v789_v54, %v677_v8  ;;  %vm1139_vm9 = vcmp.eq.f32.partialorder %v1138_v29, 8.507059e+37  ;;  %v1141_v42 = vor.u32 1.1754944e-38, %v1140_v30  ;;  %v499_v8 = vld [vmem:[%s3198_s1 + $0x2e8] sm:$0xff] }
 0x1d2   : > { %v900_v7 = vadd.f32 %v899_v4, %v787_v61  ;;  %v1117_v9 = vmul.f32 %v2107_v59, %v1116_v3  ;;  %v792_v11 = vpop.f32.mrf.mxu2 }
 0x1d4   : > { %v2109_v13 = vpop.eup %2108  ;;  %v2021_v10 = vmul.f32 -1.442695, %v900_v7  ;;  %v1118_v14 = vadd.f32 %v2107_v59, %v1117_v9  ;;  %v498_v7 = vld [vmem:[%s3198_s1 + $0x2e0] sm:$0xff] }
 0x1d5   : > { %v2111_v16 = vpop.eup %2110  ;;  %v2792_v17 = vadd.f32 1.0, %v2109_v13 }
 0x1d6   : > { %2112 = vpow2.f32 %v2021_v10  ;;  %949 = vmatmul.f32.gmra.mxu3 %v489_v12  ;;  %v1122_v20 = vsel %vm1121_vm4, %v2107_v59, %v1118_v14  ;;  %v566_v21 = vpop.f32.mrf.mxu0  ;;  %v679_v22 = vpop.f32.mrf.mxu1  ;;  %v1130_v25 = vmul.f32 %v2111_v16, %v2777_v60  ;;  %vm1135_vm6 = vweird.f32 %v2111_v16  ;;  %v497_v59 = vld [vmem:[%s3198_s1 + $0x2d8] sm:$0xff] }
 0x1d7   : > { %2114 = vrcp.f32 %v2792_v17  ;;  %v1127_v26 = vsel %vm1124_vm5, %v1126_v18, %v1122_v20  ;;  %842 = vmatmul.f32.gmra.mxu2 %v496_v15  ;;  %v680_v32 = vadd.f32 %v679_v22, %v566_v21  ;;  %vm1136_vm8 = vmor %vm1134_vm7, %vm1135_vm6  ;;  %v1153_v53 = vand.u32 2147483647, %v2792_v17 }
 0x1d8   : > { %1596 = vperm.xlu1 %2097, %v1127_v26   ;;  %v1131_v27 = vsub.f32 1.0, %v1130_v25  ;;  %v1155_v54 = vand.u32 2147483648, %v2792_v17  ;;  %vm1149_vm11 = vweird.f32 %v2792_v17 }
 0x1d9   : > { %v902_v28 = vpop.f32.mrf.mxu3  ;;  %613 = vmatmul.f32.gmra.mxu0 %v490_v23  ;;  %726 = vmatmul.f32.gmra.mxu1 %v491_v24  ;;  %v793_v43 = vadd.f32 %v792_v11, %v680_v32  ;;  %vm1154_vm13 = vcmp.eq.f32.partialorder %v1153_v53, 8.507059e+37  ;;  %v508_v23 = vld [vmem:[%s3198_s1 + $0x330] sm:$0xff]  ;;  %v503_v32 = vld [vmem:[%s3198_s1 + $0x308] sm:$0xff] }
 0x1da   : > { %v903_v31 = vadd.f32 %v902_v28, %v790_v19  ;;  %v1132_v33 = vmul.f32 %v2111_v16, %v1131_v27  ;;  %v795_v34 = vpop.f32.mrf.mxu2  ;;  %v1156_v2 = vor.u32 1.1754944e-38, %v1155_v54  ;;  %v501_v19 = vld [vmem:[%s3198_s1 + $0x2f8] sm:$0xff] }
 0x1dc   : > { %v2113_v36 = vpop.eup %2112  ;;  %v2022_v37 = vmul.f32 -1.442695, %v903_v31  ;;  %v1133_v38 = vadd.f32 %v2111_v16, %v1132_v33  ;;  %v502_v31 = vld [vmem:[%s3198_s1 + $0x300] sm:$0xff] }
 0x1dd   : > { %v2115_v40 = vpop.eup %2114  ;;  %v2811_v41 = vadd.f32 1.0, %v2113_v36 }
 0x1de   : > { %2116 = vpow2.f32 %v2022_v37  ;;  %952 = vmatmul.f32.gmra.mxu3 %v493_v35  ;;  %v1137_v44 = vsel %vm1136_vm8, %v2111_v16, %v1133_v38  ;;  %v569_v45 = vpop.f32.mrf.mxu0  ;;  %v682_v46 = vpop.f32.mrf.mxu1  ;;  %v1145_v49 = vmul.f32 %v2115_v40, %v2792_v17  ;;  %vm1150_vm10 = vweird.f32 %v2115_v40 }
 0x1df   : > { %2118 = vrcp.f32 %v2811_v41  ;;  %v1142_v50 = vsel %vm1139_vm9, %v1141_v42, %v1137_v44  ;;  %845 = vmatmul.f32.gmra.mxu2 %v500_v39  ;;  %v683_v56 = vadd.f32 %v682_v46, %v569_v45  ;;  %vm1151_vm12 = vmor %vm1149_vm11, %vm1150_vm10  ;;  %v1168_v10 = vand.u32 2147483647, %v2811_v41 }
 0x1e0   : > { %1601 = vperm.xlu2 %2098, %v1142_v50   ;;  %v1146_v51 = vsub.f32 1.0, %v1145_v49  ;;  %v1170_v14 = vand.u32 2147483648, %v2811_v41  ;;  %vm1164_vm15 = vweird.f32 %v2811_v41 }
 0x1e1   : > { %v905_v52 = vpop.f32.mrf.mxu3  ;;  %616 = vmatmul.f32.gmra.mxu0 %v494_v47  ;;  %729 = vmatmul.f32.gmra.mxu1 %v495_v48  ;;  %v796_v3 = vadd.f32 %v795_v34, %v683_v56  ;;  %vm1169_vm2 = vcmp.eq.f32.partialorder %v1168_v10, 8.507059e+37  ;;  %v512_v47 = vld [vmem:[%s3198_s1 + $0x350] sm:$0xff]  ;;  %v507_v56 = vld [vmem:[%s3198_s1 + $0x328] sm:$0xff] }
 0x1e2   : > { %v906_v55 = vadd.f32 %v905_v52, %v793_v43  ;;  %v1147_v57 = vmul.f32 %v2115_v40, %v1146_v51  ;;  %v798_v58 = vpop.f32.mrf.mxu2  ;;  %v1171_v26 = vor.u32 1.1754944e-38, %v1170_v14  ;;  %v505_v43 = vld [vmem:[%s3198_s1 + $0x318] sm:$0xff] }
 0x1e4   : > { %v2117_v60 = vpop.eup %2116  ;;  %v2023_v61 = vmul.f32 -1.442695, %v906_v55  ;;  %v1148_v62 = vadd.f32 %v2115_v40, %v1147_v57  ;;  %v506_v55 = vld [vmem:[%s3198_s1 + $0x320] sm:$0xff] }
 0x1e5   : > { %v2119_v0 = vpop.eup %2118  ;;  %v2830_v1 = vadd.f32 1.0, %v2117_v60 }
 0x1e6   : > { %2120 = vpow2.f32 %v2023_v61  ;;  %955 = vmatmul.f32.gmra.mxu3 %v497_v59  ;;  %v1152_v4 = vsel %vm1151_vm12, %v2115_v40, %v1148_v62  ;;  %v572_v5 = vpop.f32.mrf.mxu0  ;;  %v685_v6 = vpop.f32.mrf.mxu1  ;;  %v1160_v9 = vmul.f32 %v2119_v0, %v2811_v41  ;;  %vm1165_vm14 = vweird.f32 %v2119_v0 }
 0x1e7   : > { %2122 = vrcp.f32 %v2830_v1  ;;  %v1157_v11 = vsel %vm1154_vm13, %v1156_v2, %v1152_v4  ;;  %848 = vmatmul.f32.gmra.mxu2 %v504_v63  ;;  %v686_v16 = vadd.f32 %v685_v6, %v572_v5  ;;  %vm1166_vm1 = vmor %vm1164_vm15, %vm1165_vm14  ;;  %v1183_v37 = vand.u32 2147483647, %v2830_v1 }
 0x1e8   : > { %1606 = vperm.xlu0 %2099, %v1157_v11   ;;  %v1161_v12 = vsub.f32 1.0, %v1160_v9  ;;  %v1185_v38 = vand.u32 2147483648, %v2830_v1  ;;  %vm1179_vm4 = vweird.f32 %v2830_v1 }
 0x1e9   : > { %v908_v13 = vpop.f32.mrf.mxu3  ;;  %619 = vmatmul.f32.gmra.mxu0 %v498_v7  ;;  %732 = vmatmul.f32.gmra.mxu1 %v499_v8  ;;  %v799_v27 = vadd.f32 %v798_v58, %v686_v16  ;;  %vm1184_vm6 = vcmp.eq.f32.partialorder %v1183_v37, 8.507059e+37  ;;  %v516_v7 = vld [vmem:[%s3198_s1 + $0x370] sm:$0xff]  ;;  %v511_v16 = vld [vmem:[%s3198_s1 + $0x348] sm:$0xff] }
 0x1ea   : > { %v909_v15 = vadd.f32 %v908_v13, %v796_v3  ;;  %v1162_v17 = vmul.f32 %v2119_v0, %v1161_v12  ;;  %v801_v18 = vpop.f32.mrf.mxu2  ;;  %v1186_v50 = vor.u32 1.1754944e-38, %v1185_v38  ;;  %v509_v3 = vld [vmem:[%s3198_s1 + $0x338] sm:$0xff] }
 0x1ec   : > { %v2121_v20 = vpop.eup %2120  ;;  %v2024_v21 = vmul.f32 -1.442695, %v909_v15  ;;  %v1163_v22 = vadd.f32 %v2119_v0, %v1162_v17  ;;  %v510_v15 = vld [vmem:[%s3198_s1 + $0x340] sm:$0xff] }
 0x1ed   : > { %v2123_v24 = vpop.eup %2122  ;;  %v2849_v25 = vadd.f32 1.0, %v2121_v20 }
 0x1ee   : > { %2124 = vpow2.f32 %v2024_v21  ;;  %958 = vmatmul.f32.gmra.mxu3 %v501_v19  ;;  %v1167_v28 = vsel %vm1166_vm1, %v2119_v0, %v1163_v22  ;;  %v575_v29 = vpop.f32.mrf.mxu0  ;;  %v688_v30 = vpop.f32.mrf.mxu1  ;;  %v1175_v33 = vmul.f32 %v2123_v24, %v2830_v1  ;;  %vm1180_vm3 = vweird.f32 %v2123_v24 }
 0x1ef   : > { %2126 = vrcp.f32 %v2849_v25  ;;  %v1172_v34 = vsel %vm1169_vm2, %v1171_v26, %v1167_v28  ;;  %851 = vmatmul.f32.gmra.mxu2 %v508_v23  ;;  %v689_v40 = vadd.f32 %v688_v30, %v575_v29  ;;  %vm1181_vm5 = vmor %vm1179_vm4, %vm1180_vm3  ;;  %v1198_v61 = vand.u32 2147483647, %v2849_v25 }
 0x1f0   : > { %1611 = vperm.xlu2 %2098, %v1172_v34   ;;  %v1176_v35 = vsub.f32 1.0, %v1175_v33  ;;  %v1200_v62 = vand.u32 2147483648, %v2849_v25  ;;  %vm1194_vm8 = vweird.f32 %v2849_v25 }
 0x1f1   : > { %v911_v36 = vpop.f32.mrf.mxu3  ;;  %622 = vmatmul.f32.gmra.mxu0 %v502_v31  ;;  %735 = vmatmul.f32.gmra.mxu1 %v503_v32  ;;  %v802_v51 = vadd.f32 %v801_v18, %v689_v40  ;;  %vm1199_vm10 = vcmp.eq.f32.partialorder %v1198_v61, 8.507059e+37  ;;  %v520_v31 = vld [vmem:[%s3198_s1 + $0x390] sm:$0xff]  ;;  %v515_v40 = vld [vmem:[%s3198_s1 + $0x368] sm:$0xff] }
 0x1f2   : > { %v912_v39 = vadd.f32 %v911_v36, %v799_v27  ;;  %v1177_v41 = vmul.f32 %v2123_v24, %v1176_v35  ;;  %v804_v42 = vpop.f32.mrf.mxu2  ;;  %v1201_v11 = vor.u32 1.1754944e-38, %v1200_v62  ;;  %v513_v27 = vld [vmem:[%s3198_s1 + $0x358] sm:$0xff] }
 0x1f4   : > { %v2125_v44 = vpop.eup %2124  ;;  %v2025_v45 = vmul.f32 -1.442695, %v912_v39  ;;  %v1178_v46 = vadd.f32 %v2123_v24, %v1177_v41  ;;  %v514_v39 = vld [vmem:[%s3198_s1 + $0x360] sm:$0xff] }
 0x1f5   : > { %v2127_v48 = vpop.eup %2126  ;;  %v2868_v49 = vadd.f32 1.0, %v2125_v44 }
 0x1f6   : > { %2128 = vpow2.f32 %v2025_v45  ;;  %961 = vmatmul.f32.gmra.mxu3 %v505_v43  ;;  %v1182_v52 = vsel %vm1181_vm5, %v2123_v24, %v1178_v46  ;;  %v578_v53 = vpop.f32.mrf.mxu0  ;;  %v691_v54 = vpop.f32.mrf.mxu1  ;;  %v1190_v57 = vmul.f32 %v2127_v48, %v2849_v25  ;;  %vm1195_vm7 = vweird.f32 %v2127_v48 }
 0x1f7   : > { %2130 = vrcp.f32 %v2868_v49  ;;  %v1187_v58 = vsel %vm1184_vm6, %v1186_v50, %v1182_v52  ;;  %854 = vmatmul.f32.gmra.mxu2 %v512_v47  ;;  %v692_v0 = vadd.f32 %v691_v54, %v578_v53  ;;  %vm1196_vm9 = vmor %vm1194_vm8, %vm1195_vm7  ;;  %v1213_v21 = vand.u32 2147483647, %v2868_v49 }
 0x1f8   : > { %1616 = vperm.xlu1 %2097, %v1187_v58   ;;  %v1191_v59 = vsub.f32 1.0, %v1190_v57  ;;  %v1215_v22 = vand.u32 2147483648, %v2868_v49  ;;  %vm1209_vm12 = vweird.f32 %v2868_v49 }
 0x1f9   : > { %v914_v60 = vpop.f32.mrf.mxu3  ;;  %625 = vmatmul.f32.gmra.mxu0 %v506_v55  ;;  %738 = vmatmul.f32.gmra.mxu1 %v507_v56  ;;  %v805_v12 = vadd.f32 %v804_v42, %v692_v0  ;;  %vm1214_vm14 = vcmp.eq.f32.partialorder %v1213_v21, 8.507059e+37  ;;  %v524_v55 = vld [vmem:[%s3198_s1 + $0x3b0] sm:$0xff]  ;;  %v519_v0 = vld [vmem:[%s3198_s1 + $0x388] sm:$0xff] }
 0x1fa   : > { %v915_v63 = vadd.f32 %v914_v60, %v802_v51  ;;  %v1192_v1 = vmul.f32 %v2127_v48, %v1191_v59  ;;  %v807_v2 = vpop.f32.mrf.mxu2  ;;  %v1216_v34 = vor.u32 1.1754944e-38, %v1215_v22  ;;  %v517_v51 = vld [vmem:[%s3198_s1 + $0x378] sm:$0xff] }
 0x1fc   : > { %v2129_v4 = vpop.eup %2128  ;;  %v2026_v5 = vmul.f32 -1.442695, %v915_v63  ;;  %v1193_v6 = vadd.f32 %v2127_v48, %v1192_v1  ;;  %v518_v63 = vld [vmem:[%s3198_s1 + $0x380] sm:$0xff] }
 0x1fd   : > { %v2131_v8 = vpop.eup %2130  ;;  %v2887_v9 = vadd.f32 1.0, %v2129_v4 }
 0x1fe   : > { %2132 = vpow2.f32 %v2026_v5  ;;  %964 = vmatmul.f32.gmra.mxu3 %v509_v3  ;;  %v1197_v13 = vsel %vm1196_vm9, %v2127_v48, %v1193_v6  ;;  %v581_v10 = vpop.f32.mrf.mxu0  ;;  %v694_v14 = vpop.f32.mrf.mxu1  ;;  %v1205_v17 = vmul.f32 %v2131_v8, %v2868_v49  ;;  %vm1210_vm11 = vweird.f32 %v2131_v8 }
 0x1ff   : > { %2134 = vrcp.f32 %v2887_v9  ;;  %v1202_v18 = vsel %vm1199_vm10, %v1201_v11, %v1197_v13  ;;  %857 = vmatmul.f32.gmra.mxu2 %v516_v7  ;;  %v695_v24 = vadd.f32 %v694_v14, %v581_v10  ;;  %vm1211_vm13 = vmor %vm1209_vm12, %vm1210_vm11  ;;  %v1228_v45 = vand.u32 2147483647, %v2887_v9 }
 0x200   : > { %1621 = vperm.xlu2 %2098, %v1202_v18   ;;  %v1206_v19 = vsub.f32 1.0, %v1205_v17  ;;  %v1230_v46 = vand.u32 2147483648, %v2887_v9  ;;  %vm1224_vm1 = vweird.f32 %v2887_v9 }
 0x201   : > { %v917_v20 = vpop.f32.mrf.mxu3  ;;  %628 = vmatmul.f32.gmra.mxu0 %v510_v15  ;;  %741 = vmatmul.f32.gmra.mxu1 %v511_v16  ;;  %v808_v35 = vadd.f32 %v807_v2, %v695_v24  ;;  %vm1229_vm3 = vcmp.eq.f32.partialorder %v1228_v45, 8.507059e+37  ;;  %v528_v15 = vld [vmem:[%s3198_s1 + $0x3d0] sm:$0xff]  ;;  %v523_v24 = vld [vmem:[%s3198_s1 + $0x3a8] sm:$0xff] }
 0x202   : > { %v918_v23 = vadd.f32 %v917_v20, %v805_v12  ;;  %v1207_v25 = vmul.f32 %v2131_v8, %v1206_v19  ;;  %v810_v26 = vpop.f32.mrf.mxu2  ;;  %v1231_v58 = vor.u32 1.1754944e-38, %v1230_v46  ;;  %v521_v12 = vld [vmem:[%s3198_s1 + $0x398] sm:$0xff] }
 0x204   : > { %v2133_v28 = vpop.eup %2132  ;;  %v2027_v29 = vmul.f32 -1.442695, %v918_v23  ;;  %v1208_v30 = vadd.f32 %v2131_v8, %v1207_v25  ;;  %v522_v23 = vld [vmem:[%s3198_s1 + $0x3a0] sm:$0xff] }
 0x205   : > { %v2135_v32 = vpop.eup %2134  ;;  %v2906_v33 = vadd.f32 1.0, %v2133_v28 }
 0x206   : > { %2136 = vpow2.f32 %v2027_v29  ;;  %967 = vmatmul.f32.gmra.mxu3 %v513_v27  ;;  %v1212_v36 = vsel %vm1211_vm13, %v2131_v8, %v1208_v30  ;;  %v584_v37 = vpop.f32.mrf.mxu0  ;;  %v697_v38 = vpop.f32.mrf.mxu1  ;;  %v1220_v41 = vmul.f32 %v2135_v32, %v2887_v9  ;;  %vm1225_vm15 = vweird.f32 %v2135_v32 }
 0x207   : > { %2138 = vrcp.f32 %v2906_v33  ;;  %v1217_v42 = vsel %vm1214_vm14, %v1216_v34, %v1212_v36  ;;  %860 = vmatmul.f32.gmra.mxu2 %v520_v31  ;;  %v698_v48 = vadd.f32 %v697_v38, %v584_v37  ;;  %vm1226_vm2 = vmor %vm1224_vm1, %vm1225_vm15  ;;  %v1243_v5 = vand.u32 2147483647, %v2906_v33 }
 0x208   : > { %1626 = vperm.xlu1 %2097, %v1217_v42   ;;  %v1221_v43 = vsub.f32 1.0, %v1220_v41  ;;  %v1245_v6 = vand.u32 2147483648, %v2906_v33  ;;  %vm1239_vm5 = vweird.f32 %v2906_v33 }
 0x209   : > { %v920_v44 = vpop.f32.mrf.mxu3  ;;  %631 = vmatmul.f32.gmra.mxu0 %v514_v39  ;;  %744 = vmatmul.f32.gmra.mxu1 %v515_v40  ;;  %v811_v59 = vadd.f32 %v810_v26, %v698_v48  ;;  %vm1244_vm7 = vcmp.eq.f32.partialorder %v1243_v5, 8.507059e+37  ;;  %v532_v39 = vld [vmem:[%s3198_s1 + $0x3f0] sm:$0xff]  ;;  %v527_v48 = vld [vmem:[%s3198_s1 + $0x3c8] sm:$0xff] }
 0x20a   : > { %v921_v47 = vadd.f32 %v920_v44, %v808_v35  ;;  %v1222_v49 = vmul.f32 %v2135_v32, %v1221_v43  ;;  %v813_v50 = vpop.f32.mrf.mxu2  ;;  %v1246_v18 = vor.u32 1.1754944e-38, %v1245_v6  ;;  %v525_v35 = vld [vmem:[%s3198_s1 + $0x3b8] sm:$0xff]  ;;  %v530_v6 = vld [vmem:[%s3198_s1 + $0x3e0] sm:$0xff] }
 0x20c   : > { %v2137_v52 = vpop.eup %2136  ;;  %v2028_v53 = vmul.f32 -1.442695, %v921_v47  ;;  %v1223_v54 = vadd.f32 %v2135_v32, %v1222_v49  ;;  %v526_v47 = vld [vmem:[%s3198_s1 + $0x3c0] sm:$0xff] }
 0x20d   : > { %v2139_v56 = vpop.eup %2138  ;;  %v2925_v57 = vadd.f32 1.0, %v2137_v52 }
 0x20e   : > { %2140 = vpow2.f32 %v2028_v53  ;;  %970 = vmatmul.f32.gmra.mxu3 %v517_v51  ;;  %v1227_v60 = vsel %vm1226_vm2, %v2135_v32, %v1223_v54  ;;  %v587_v61 = vpop.f32.mrf.mxu0  ;;  %v700_v62 = vpop.f32.mrf.mxu1  ;;  %v1235_v1 = vmul.f32 %v2139_v56, %v2906_v33  ;;  %vm1240_vm4 = vweird.f32 %v2139_v56 }
 0x20f   : > { %2142 = vrcp.f32 %v2925_v57  ;;  %v1232_v2 = vsel %vm1229_vm3, %v1231_v58, %v1227_v60  ;;  %863 = vmatmul.f32.gmra.mxu2 %v524_v55  ;;  %v701_v8 = vadd.f32 %v700_v62, %v587_v61  ;;  %vm1241_vm6 = vmor %vm1239_vm5, %vm1240_vm4  ;;  %v1258_v29 = vand.u32 2147483647, %v2925_v57 }
 0x210   : > { %1631 = vperm.xlu2 %2098, %v1232_v2   ;;  %v1236_v3 = vsub.f32 1.0, %v1235_v1  ;;  %v1260_v30 = vand.u32 2147483648, %v2925_v57  ;;  %vm1254_vm9 = vweird.f32 %v2925_v57 }
 0x211   : > { %v923_v4 = vpop.f32.mrf.mxu3  ;;  %634 = vmatmul.f32.gmra.mxu0 %v518_v63  ;;  %747 = vmatmul.f32.gmra.mxu1 %v519_v0  ;;  %v814_v19 = vadd.f32 %v813_v50, %v701_v8  ;;  %vm1259_vm11 = vcmp.eq.f32.partialorder %v1258_v29, 8.507059e+37 }
 0x212   : > { %v924_v7 = vadd.f32 %v923_v4, %v811_v59  ;;  %v1237_v9 = vmul.f32 %v2139_v56, %v1236_v3  ;;  %v816_v11 = vpop.f32.mrf.mxu2  ;;  %v1261_v42 = vor.u32 1.1754944e-38, %v1260_v30  ;;  %v529_v59 = vld [vmem:[%s3198_s1 + $0x3d8] sm:$0xff] }
 0x214   : > { %v2141_v13 = vpop.eup %2140  ;;  %v2029_v10 = vmul.f32 -1.442695, %v924_v7  ;;  %v1238_v14 = vadd.f32 %v2139_v56, %v1237_v9  ;;  %v531_v7 = vld [vmem:[%s3198_s1 + $0x3e8] sm:$0xff] }
 0x215   : > { %v2143_v16 = vpop.eup %2142  ;;  %v2944_v17 = vadd.f32 1.0, %v2141_v13 }
 0x216   : > { %2144 = vpow2.f32 %v2029_v10  ;;  %973 = vmatmul.f32.gmra.mxu3 %v521_v12  ;;  %v1242_v20 = vsel %vm1241_vm6, %v2139_v56, %v1238_v14  ;;  %v590_v21 = vpop.f32.mrf.mxu0  ;;  %v703_v22 = vpop.f32.mrf.mxu1  ;;  %v1250_v25 = vmul.f32 %v2143_v16, %v2925_v57  ;;  %vm1255_vm8 = vweird.f32 %v2143_v16 }
 0x217   : > { %2146 = vrcp.f32 %v2944_v17  ;;  %v1247_v26 = vsel %vm1244_vm7, %v1246_v18, %v1242_v20  ;;  %866 = vmatmul.f32.gmra.mxu2 %v528_v15  ;;  %v704_v32 = vadd.f32 %v703_v22, %v590_v21  ;;  %vm1256_vm10 = vmor %vm1254_vm9, %vm1255_vm8  ;;  %v1273_v53 = vand.u32 2147483647, %v2944_v17  ;;  %v533_v18 = vld [vmem:[%s3198_s1 + $0x3f8] sm:$0xff] }
 0x218   : > { %1636 = vperm.xlu1 %2097, %v1247_v26   ;;  %v1251_v27 = vsub.f32 1.0, %v1250_v25  ;;  %v1275_v54 = vand.u32 2147483648, %v2944_v17  ;;  %vm1269_vm13 = vweird.f32 %v2944_v17 }
 0x219   : > { %v926_v28 = vpop.f32.mrf.mxu3  ;;  %637 = vmatmul.f32.gmra.mxu0 %v522_v23  ;;  %750 = vmatmul.f32.gmra.mxu1 %v523_v24  ;;  %v817_v43 = vadd.f32 %v816_v11, %v704_v32  ;;  %vm1274_vm15 = vcmp.eq.f32.partialorder %v1273_v53, 8.507059e+37 }
 0x21a   : > { %v927_v31 = vadd.f32 %v926_v28, %v814_v19  ;;  %v1252_v33 = vmul.f32 %v2143_v16, %v1251_v27  ;;  %v819_v34 = vpop.f32.mrf.mxu2  ;;  %v1276_v1 = vor.u32 1.1754944e-38, %v1275_v54 }
 0x21c   : > { %v2145_v36 = vpop.eup %2144  ;;  %v2030_v37 = vmul.f32 -1.442695, %v927_v31  ;;  %v1253_v38 = vadd.f32 %v2143_v16, %v1252_v33 }
 0x21d   : > { %v2147_v40 = vpop.eup %2146  ;;  %v2963_v41 = vadd.f32 1.0, %v2145_v36 }
 0x21e   : > { %2148 = vpow2.f32 %v2030_v37  ;;  %976 = vmatmul.f32.gmra.mxu3 %v525_v35  ;;  %v1257_v44 = vsel %vm1256_vm10, %v2143_v16, %v1253_v38  ;;  %v593_v45 = vpop.f32.mrf.mxu0  ;;  %v706_v46 = vpop.f32.mrf.mxu1  ;;  %v1265_v49 = vmul.f32 %v2147_v40, %v2944_v17  ;;  %vm1270_vm12 = vweird.f32 %v2147_v40 }
 0x21f   : > { %2150 = vrcp.f32 %v2963_v41  ;;  %v1262_v50 = vsel %vm1259_vm11, %v1261_v42, %v1257_v44  ;;  %869 = vmatmul.f32.gmra.mxu2 %v532_v39  ;;  %v707_v56 = vadd.f32 %v706_v46, %v593_v45  ;;  %vm1271_vm14 = vmor %vm1269_vm13, %vm1270_vm12  ;;  %v1288_v13 = vand.u32 2147483647, %v2963_v41 }
 0x220   : > { %1641 = vperm.xlu0 %2099, %v1262_v50   ;;  %v1266_v51 = vsub.f32 1.0, %v1265_v49  ;;  %v1290_v10 = vand.u32 2147483648, %v2963_v41  ;;  %vm1284_vm2 = vweird.f32 %v2963_v41 }
 0x221   : > { %v929_v52 = vpop.f32.mrf.mxu3  ;;  %640 = vmatmul.f32.gmra.mxu0 %v526_v47  ;;  %753 = vmatmul.f32.gmra.mxu1 %v527_v48  ;;  %v820_v2 = vadd.f32 %v819_v34, %v707_v56  ;;  %vm1289_vm4 = vcmp.eq.f32.partialorder %v1288_v13, 8.507059e+37 }
 0x222   : > { %v930_v55 = vadd.f32 %v929_v52, %v817_v43  ;;  %v1267_v57 = vmul.f32 %v2147_v40, %v1266_v51  ;;  %v822_v58 = vpop.f32.mrf.mxu2  ;;  %v1291_v24 = vor.u32 1.1754944e-38, %v1290_v10 }
 0x224   : > { %v2149_v60 = vpop.eup %2148  ;;  %v2031_v61 = vmul.f32 -1.442695, %v930_v55  ;;  %v1268_v62 = vadd.f32 %v2147_v40, %v1267_v57 }
 0x225   : > { %v2151_v63 = vpop.eup %2150  ;;  %v2979_v0 = vadd.f32 1.0, %v2149_v60 }
 0x226   : > { %2152 = vpow2.f32 %v2031_v61  ;;  %979 = vmatmul.f32.gmra.mxu3 %v529_v59  ;;  %v1272_v3 = vsel %vm1271_vm14, %v2147_v40, %v1268_v62  ;;  %v596_v4 = vpop.f32.mrf.mxu0  ;;  %v709_v5 = vpop.f32.mrf.mxu1  ;;  %v1280_v8 = vmul.f32 %v2151_v63, %v2963_v41  ;;  %vm1285_vm1 = vweird.f32 %v2151_v63 }
 0x227   : > { %2154 = vrcp.f32 %v2979_v0  ;;  %v1277_v9 = vsel %vm1274_vm15, %v1276_v1, %v1272_v3  ;;  %v710_v15 = vadd.f32 %v709_v5, %v596_v4  ;;  %vm1286_vm3 = vmor %vm1284_vm2, %vm1285_vm1  ;;  %v1303_v33 = vand.u32 2147483647, %v2979_v0 }
 0x228   : > { %1646 = vperm.xlu2 %2098, %v1277_v9   ;;  %v1281_v11 = vsub.f32 1.0, %v1280_v8  ;;  %v1305_v34 = vand.u32 2147483648, %v2979_v0  ;;  %vm1299_vm6 = vweird.f32 %v2979_v0 }
 0x229   : > { %v932_v12 = vpop.f32.mrf.mxu3  ;;  %643 = vmatmul.f32.gmra.mxu0 %v530_v6  ;;  %756 = vmatmul.f32.gmra.mxu1 %v531_v7  ;;  %v823_v25 = vadd.f32 %v822_v58, %v710_v15  ;;  %vm1304_vm8 = vcmp.eq.f32.partialorder %v1303_v33, 8.507059e+37 }
 0x22a   : > { %v933_v14 = vadd.f32 %v932_v12, %v820_v2  ;;  %v1282_v16 = vmul.f32 %v2151_v63, %v1281_v11  ;;  %v825_v17 = vpop.f32.mrf.mxu2  ;;  %v1306_v44 = vor.u32 1.1754944e-38, %v1305_v34 }
 0x22c   : > { %v2153_v19 = vpop.eup %2152  ;;  %v2032_v20 = vmul.f32 -1.442695, %v933_v14  ;;  %v1283_v21 = vadd.f32 %v2151_v63, %v1282_v16 }
 0x22d   : > { %v2155_v22 = vpop.eup %2154  ;;  %v1095_v23 = vadd.f32 1.0, %v2153_v19 }
 0x22e   : > { %2156 = vpow2.f32 %v2032_v20  ;;  %982 = vmatmul.f32.gmra.mxu3 %v533_v18  ;;  %v1287_v26 = vsel %vm1286_vm3, %v2151_v63, %v1283_v21  ;;  %v599_v27 = vpop.f32.mrf.mxu0  ;;  %v712_v28 = vpop.f32.mrf.mxu1  ;;  %v1295_v29 = vmul.f32 %v2155_v22, %v2979_v0  ;;  %vm1300_vm5 = vweird.f32 %v2155_v22 }
 0x22f   : > { %2158 = vrcp.f32 %v1095_v23  ;;  %v1292_v30 = vsel %vm1289_vm4, %v1291_v24, %v1287_v26  ;;  %v713_v36 = vadd.f32 %v712_v28, %v599_v27  ;;  %vm1301_vm7 = vmor %vm1299_vm6, %vm1300_vm5  ;;  %v1318_v53 = vand.u32 2147483647, %v1095_v23 }
 0x230   : > { %1651 = vperm.xlu1 %2097, %v1292_v30   ;;  %v1296_v31 = vsub.f32 1.0, %v1295_v29  ;;  %v1320_v54 = vand.u32 2147483648, %v1095_v23  ;;  %vm1314_vm10 = vweird.f32 %v1095_v23 }
 0x231   : > { %v935_v32 = vpop.f32.mrf.mxu3  ;;  %v826_v45 = vadd.f32 %v825_v17, %v713_v36  ;;  %vm1319_vm12 = vcmp.eq.f32.partialorder %v1318_v53, 8.507059e+37 }
 0x232   : > { %v936_v35 = vadd.f32 %v935_v32, %v823_v25  ;;  %v1297_v37 = vmul.f32 %v2155_v22, %v1296_v31  ;;  %v828_v38 = vpop.f32.mrf.mxu2  ;;  %v1321_v0 = vor.u32 1.1754944e-38, %v1320_v54 }
 0x234   : > { %v2157_v39 = vpop.eup %2156  ;;  %v2033_v40 = vmul.f32 -1.442695, %v936_v35  ;;  %v1298_v41 = vadd.f32 %v2155_v22, %v1297_v37 }
 0x235   : > { %v2159_v42 = vpop.eup %2158  ;;  %v1096_v43 = vadd.f32 1.0, %v2157_v39 }
 0x236   : > { %2160 = vpow2.f32 %v2033_v40  ;;  %v1302_v46 = vsel %vm1301_vm7, %v2155_v22, %v1298_v41  ;;  %v602_v47 = vpop.f32.mrf.mxu0  ;;  %v715_v48 = vpop.f32.mrf.mxu1  ;;  %v1310_v49 = vmul.f32 %v2159_v42, %v1095_v23  ;;  %vm1315_vm9 = vweird.f32 %v2159_v42 }
 0x237   : > { %2162 = vrcp.f32 %v1096_v43  ;;  %v1307_v50 = vsel %vm1304_vm8, %v1306_v44, %v1302_v46  ;;  %v716_v56 = vadd.f32 %v715_v48, %v602_v47  ;;  %vm1316_vm11 = vmor %vm1314_vm10, %vm1315_vm9  ;;  %v1333_v9 = vand.u32 2147483647, %v1096_v43 }
 0x238   : > { %1656 = vperm.xlu0 %2099, %v1307_v50   ;;  %v1311_v51 = vsub.f32 1.0, %v1310_v49  ;;  %v1335_v11 = vand.u32 2147483648, %v1096_v43  ;;  %vm1329_vm14 = vweird.f32 %v1096_v43 }
 0x239   : > { %v938_v52 = vpop.f32.mrf.mxu3  ;;  %v829_v1 = vadd.f32 %v828_v38, %v716_v56  ;;  %vm1334_vm1 = vcmp.eq.f32.partialorder %v1333_v9, 8.507059e+37 }
 0x23a   : > { %v939_v55 = vadd.f32 %v938_v52, %v826_v45  ;;  %v1312_v57 = vmul.f32 %v2159_v42, %v1311_v51  ;;  %v831_v58 = vpop.f32.mrf.mxu2  ;;  %v1336_v20 = vor.u32 1.1754944e-38, %v1335_v11 }
 0x23c   : > { %v2161_v59 = vpop.eup %2160  ;;  %v2034_v60 = vmul.f32 -1.442695, %v939_v55  ;;  %v1313_v61 = vadd.f32 %v2159_v42, %v1312_v57 }
 0x23d   : > { %v2163_v62 = vpop.eup %2162  ;;  %v2999_v63 = vadd.f32 1.0, %v2161_v59 }
 0x23e   : > { %2164 = vpow2.f32 %v2034_v60  ;;  %v1317_v2 = vsel %vm1316_vm11, %v2159_v42, %v1313_v61  ;;  %v605_v3 = vpop.f32.mrf.mxu0  ;;  %v718_v4 = vpop.f32.mrf.mxu1  ;;  %v1325_v5 = vmul.f32 %v2163_v62, %v1096_v43  ;;  %vm1330_vm13 = vweird.f32 %v2163_v62 }
 0x23f   : > { %2166 = vrcp.f32 %v2999_v63  ;;  %v1322_v6 = vsel %vm1319_vm12, %v1321_v0, %v1317_v2  ;;  %v719_v13 = vadd.f32 %v718_v4, %v605_v3  ;;  %vm1331_vm15 = vmor %vm1329_vm14, %vm1330_vm13  ;;  %v1350_v32 = vand.u32 2147483648, %v2999_v63 }
 0x240   : > { %1661 = vperm.xlu2 %2098, %v1322_v6   ;;  %v1326_v7 = vsub.f32 1.0, %v1325_v5  ;;  %v1348_v33 = vand.u32 2147483647, %v2999_v63  ;;  %vm1344_vm3 = vweird.f32 %v2999_v63 }
 0x241   : > { %v941_v8 = vpop.f32.mrf.mxu3  ;;  %v832_v21 = vadd.f32 %v831_v58, %v719_v13  ;;  %v1351_v41 = vor.u32 1.1754944e-38, %v1350_v32 }
 0x242   : > { %v942_v12 = vadd.f32 %v941_v8, %v829_v1  ;;  %v1327_v10 = vmul.f32 %v2163_v62, %v1326_v7  ;;  %v834_v14 = vpop.f32.mrf.mxu2  ;;  %vm1349_vm5 = vcmp.eq.f32.partialorder %v1348_v33, 8.507059e+37 }
 0x244   : > { %v2165_v15 = vpop.eup %2164  ;;  %v2035_v16 = vmul.f32 -1.442695, %v942_v12  ;;  %v1328_v17 = vadd.f32 %v2163_v62, %v1327_v10 }
 0x245   : > { %v2167_v18 = vpop.eup %2166  ;;  %v3002_v19 = vadd.f32 1.0, %v2165_v15 }
 0x246   : > { %2168 = vpow2.f32 %v2035_v16  ;;  %v1332_v22 = vsel %vm1331_vm15, %v2163_v62, %v1328_v17  ;;  %v608_v23 = vpop.f32.mrf.mxu0  ;;  %v721_v24 = vpop.f32.mrf.mxu1  ;;  %v1340_v25 = vmul.f32 %v2167_v18, %v2999_v63  ;;  %vm1345_vm2 = vweird.f32 %v2167_v18 }
 0x247   : > { %2170 = vrcp.f32 %v3002_v19  ;;  %v1337_v26 = vsel %vm1334_vm1, %v1336_v20, %v1332_v22  ;;  %v722_v30 = vadd.f32 %v721_v24, %v608_v23  ;;  %vm1346_vm4 = vmor %vm1344_vm3, %vm1345_vm2  ;;  %v1365_v51 = vand.u32 2147483648, %v3002_v19 }
 0x248   : > { %1666 = vperm.xlu1 %2097, %v1337_v26   ;;  %v1341_v27 = vsub.f32 1.0, %v1340_v25  ;;  %v1363_v53 = vand.u32 2147483647, %v3002_v19  ;;  %vm1359_vm7 = vweird.f32 %v3002_v19 }
 0x249   : > { %v944_v28 = vpop.f32.mrf.mxu3  ;;  %v835_v40 = vadd.f32 %v834_v14, %v722_v30  ;;  %v1366_v61 = vor.u32 1.1754944e-38, %v1365_v51 }
 0x24a   : > { %v945_v29 = vadd.f32 %v944_v28, %v832_v21  ;;  %v1342_v31 = vmul.f32 %v2167_v18, %v1341_v27  ;;  %v837_v34 = vpop.f32.mrf.mxu2  ;;  %vm1364_vm9 = vcmp.eq.f32.partialorder %v1363_v53, 8.507059e+37 }
 0x24c   : > { %v2169_v35 = vpop.eup %2168  ;;  %v2036_v36 = vmul.f32 -1.442695, %v945_v29  ;;  %v1343_v37 = vadd.f32 %v2167_v18, %v1342_v31 }
 0x24d   : > { %v2171_v38 = vpop.eup %2170  ;;  %v3008_v39 = vadd.f32 1.0, %v2169_v35 }
 0x24e   : > { %2172 = vpow2.f32 %v2036_v36  ;;  %v611_v42 = vpop.f32.mrf.mxu0  ;;  %v724_v43 = vpop.f32.mrf.mxu1  ;;  %v1347_v44 = vsel %vm1346_vm4, %v2167_v18, %v1343_v37  ;;  %v1355_v45 = vmul.f32 %v2171_v38, %v3002_v19  ;;  %vm1360_vm6 = vweird.f32 %v2171_v38 }
 0x24f   : > { %2174 = vrcp.f32 %v3008_v39  ;;  %v1352_v46 = vsel %vm1349_vm5, %v1351_v41, %v1347_v44  ;;  %v725_v50 = vadd.f32 %v724_v43, %v611_v42  ;;  %vm1361_vm8 = vmor %vm1359_vm7, %vm1360_vm6  ;;  %v1380_v8 = vand.u32 2147483648, %v3008_v39 }
 0x250   : > { %1671 = vperm.xlu0 %2099, %v1352_v46   ;;  %v1356_v48 = vsub.f32 1.0, %v1355_v45  ;;  %v1378_v9 = vand.u32 2147483647, %v3008_v39  ;;  %vm1374_vm11 = vweird.f32 %v3008_v39 }
 0x251   : > { %v947_v47 = vpop.f32.mrf.mxu3  ;;  %v838_v60 = vadd.f32 %v837_v34, %v725_v50  ;;  %v1381_v17 = vor.u32 1.1754944e-38, %v1380_v8 }
 0x252   : > { %v948_v49 = vadd.f32 %v947_v47, %v835_v40  ;;  %v1357_v52 = vmul.f32 %v2171_v38, %v1356_v48  ;;  %v840_v54 = vpop.f32.mrf.mxu2  ;;  %vm1379_vm13 = vcmp.eq.f32.partialorder %v1378_v9, 8.507059e+37 }
 0x254   : > { %v2173_v55 = vpop.eup %2172  ;;  %v2037_v56 = vmul.f32 -1.442695, %v948_v49  ;;  %v1358_v59 = vadd.f32 %v2171_v38, %v1357_v52 }
 0x255   : > { %v2175_v57 = vpop.eup %2174  ;;  %v3015_v58 = vadd.f32 1.0, %v2173_v55 }
 0x256   : > { %2176 = vpow2.f32 %v2037_v56  ;;  %v614_v62 = vpop.f32.mrf.mxu0  ;;  %v727_v63 = vpop.f32.mrf.mxu1  ;;  %v1370_v0 = vmul.f32 %v2175_v57, %v3008_v39  ;;  %v1362_v1 = vsel %vm1361_vm8, %v2171_v38, %v1358_v59  ;;  %vm1375_vm10 = vweird.f32 %v2175_v57 }
 0x257   : > { %2178 = vrcp.f32 %v3015_v58  ;;  %v1367_v2 = vsel %vm1364_vm9, %v1366_v61, %v1362_v1  ;;  %v728_v6 = vadd.f32 %v727_v63, %v614_v62  ;;  %vm1376_vm12 = vmor %vm1374_vm11, %vm1375_vm10  ;;  %v1395_v27 = vand.u32 2147483648, %v3015_v58 }
 0x258   : > { %v1371_v3 = vsub.f32 1.0, %v1370_v0  ;;  %1676 = vperm.xlu2 %2098, %v1367_v2   ;;  %v1393_v29 = vand.u32 2147483647, %v3015_v58  ;;  %vm1389_vm15 = vweird.f32 %v3015_v58 }
 0x259   : > { %v950_v4 = vpop.f32.mrf.mxu3  ;;  %v841_v16 = vadd.f32 %v840_v54, %v728_v6  ;;  %v1396_v37 = vor.u32 1.1754944e-38, %v1395_v27 }
 0x25a   : > { %v951_v5 = vadd.f32 %v950_v4, %v838_v60  ;;  %v1372_v7 = vmul.f32 %v2175_v57, %v1371_v3  ;;  %v843_v11 = vpop.f32.mrf.mxu2  ;;  %vm1394_vm2 = vcmp.eq.f32.partialorder %v1393_v29, 8.507059e+37 }
 0x25c   : > { %v2177_v12 = vpop.eup %2176  ;;  %v2038_v13 = vmul.f32 -1.442695, %v951_v5  ;;  %v1373_v10 = vadd.f32 %v2175_v57, %v1372_v7 }
 0x25d   : > { %v2179_v14 = vpop.eup %2178  ;;  %v3022_v15 = vadd.f32 1.0, %v2177_v12 }
 0x25e   : > { %2180 = vpow2.f32 %v2038_v13  ;;  %v617_v18 = vpop.f32.mrf.mxu0  ;;  %v730_v19 = vpop.f32.mrf.mxu1  ;;  %v1377_v20 = vsel %vm1376_vm12, %v2175_v57, %v1373_v10  ;;  %v1385_v21 = vmul.f32 %v2179_v14, %v3015_v58  ;;  %vm1390_vm14 = vweird.f32 %v2179_v14 }
 0x25f   : > { %2182 = vrcp.f32 %v3022_v15  ;;  %v1382_v22 = vsel %vm1379_vm13, %v1381_v17, %v1377_v20  ;;  %v731_v26 = vadd.f32 %v730_v19, %v617_v18  ;;  %vm1391_vm1 = vmor %vm1389_vm15, %vm1390_vm14  ;;  %v1410_v48 = vand.u32 2147483648, %v3022_v15 }
 0x260   : > { %1681 = vperm.xlu1 %2097, %v1382_v22   ;;  %v1386_v24 = vsub.f32 1.0, %v1385_v21  ;;  %v1408_v49 = vand.u32 2147483647, %v3022_v15  ;;  %vm1404_vm4 = vweird.f32 %v3022_v15 }
 0x261   : > { %v953_v23 = vpop.f32.mrf.mxu3  ;;  %v844_v36 = vadd.f32 %v843_v11, %v731_v26  ;;  %v1411_v57 = vor.u32 1.1754944e-38, %v1410_v48 }
 0x262   : > { %v954_v25 = vadd.f32 %v953_v23, %v841_v16  ;;  %v1387_v28 = vmul.f32 %v2179_v14, %v1386_v24  ;;  %v846_v30 = vpop.f32.mrf.mxu2  ;;  %vm1409_vm6 = vcmp.eq.f32.partialorder %v1408_v49, 8.507059e+37 }
 0x264   : > { %v2181_v31 = vpop.eup %2180  ;;  %v2039_v32 = vmul.f32 -1.442695, %v954_v25  ;;  %v1388_v35 = vadd.f32 %v2179_v14, %v1387_v28 }
 0x265   : > { %v2183_v33 = vpop.eup %2182  ;;  %v3029_v34 = vadd.f32 1.0, %v2181_v31 }
 0x266   : > { %2184 = vpow2.f32 %v2039_v32  ;;  %v620_v38 = vpop.f32.mrf.mxu0  ;;  %v733_v39 = vpop.f32.mrf.mxu1  ;;  %v1400_v40 = vmul.f32 %v2183_v33, %v3022_v15  ;;  %v1392_v41 = vsel %vm1391_vm1, %v2179_v14, %v1388_v35  ;;  %vm1405_vm3 = vweird.f32 %v2183_v33 }
 0x267   : > { %2186 = vrcp.f32 %v3029_v34  ;;  %v1397_v42 = vsel %vm1394_vm2, %v1396_v37, %v1392_v41  ;;  %v734_v46 = vadd.f32 %v733_v39, %v620_v38  ;;  %vm1406_vm5 = vmor %vm1404_vm4, %vm1405_vm3  ;;  %v1425_v3 = vand.u32 2147483648, %v3029_v34 }
 0x268   : > { %v1401_v43 = vsub.f32 1.0, %v1400_v40  ;;  %1686 = vperm.xlu0 %2099, %v1397_v42   ;;  %v1423_v5 = vand.u32 2147483647, %v3029_v34  ;;  %vm1419_vm8 = vweird.f32 %v3029_v34 }
 0x269   : > { %v956_v44 = vpop.f32.mrf.mxu3  ;;  %v847_v56 = vadd.f32 %v846_v30, %v734_v46  ;;  %v1426_v10 = vor.u32 1.1754944e-38, %v1425_v3 }
 0x26a   : > { %v957_v45 = vadd.f32 %v956_v44, %v844_v36  ;;  %v1402_v47 = vmul.f32 %v2183_v33, %v1401_v43  ;;  %v849_v50 = vpop.f32.mrf.mxu2  ;;  %vm1424_vm10 = vcmp.eq.f32.partialorder %v1423_v5, 8.507059e+37 }
 0x26c   : > { %v2185_v51 = vpop.eup %2184  ;;  %v2040_v52 = vmul.f32 -1.442695, %v957_v45  ;;  %v1403_v53 = vadd.f32 %v2183_v33, %v1402_v47 }
 0x26d   : > { %v2187_v54 = vpop.eup %2186  ;;  %v1103_v55 = vadd.f32 1.0, %v2185_v51 }
 0x26e   : > { %2188 = vpow2.f32 %v2040_v52  ;;  %v623_v58 = vpop.f32.mrf.mxu0  ;;  %v736_v59 = vpop.f32.mrf.mxu1  ;;  %v1407_v60 = vsel %vm1406_vm5, %v2183_v33, %v1403_v53  ;;  %v1415_v61 = vmul.f32 %v2187_v54, %v3029_v34  ;;  %vm1420_vm7 = vweird.f32 %v2187_v54 }
 0x26f   : > { %2190 = vrcp.f32 %v1103_v55  ;;  %v1412_v62 = vsel %vm1409_vm6, %v1411_v57, %v1407_v60  ;;  %v737_v2 = vadd.f32 %v736_v59, %v623_v58  ;;  %vm1421_vm9 = vmor %vm1419_vm8, %vm1420_vm7  ;;  %v1438_v21 = vand.u32 2147483647, %v1103_v55 }
 0x270   : > { %1691 = vperm.xlu2 %2098, %v1412_v62   ;;  %v1416_v0 = vsub.f32 1.0, %v1415_v61  ;;  %v1440_v22 = vand.u32 2147483648, %v1103_v55  ;;  %vm1434_vm12 = vweird.f32 %v1103_v55 }
 0x271   : > { %v959_v63 = vpop.f32.mrf.mxu3  ;;  %v850_v13 = vadd.f32 %v849_v50, %v737_v2  ;;  %vm1439_vm14 = vcmp.eq.f32.partialorder %v1438_v21, 8.507059e+37 }
 0x272   : > { %v960_v1 = vadd.f32 %v959_v63, %v847_v56  ;;  %v1417_v4 = vmul.f32 %v2187_v54, %v1416_v0  ;;  %v852_v6 = vpop.f32.mrf.mxu2  ;;  %v1441_v32 = vor.u32 1.1754944e-38, %v1440_v22 }
 0x274   : > { %v2189_v7 = vpop.eup %2188  ;;  %v2041_v8 = vmul.f32 -1.442695, %v960_v1  ;;  %v1418_v12 = vadd.f32 %v2187_v54, %v1417_v4 }
 0x275   : > { %v2191_v9 = vpop.eup %2190  ;;  %v3040_v11 = vadd.f32 1.0, %v2189_v7 }
 0x276   : > { %2192 = vpow2.f32 %v2041_v8  ;;  %v626_v14 = vpop.f32.mrf.mxu0  ;;  %v739_v15 = vpop.f32.mrf.mxu1  ;;  %v1430_v16 = vmul.f32 %v2191_v9, %v1103_v55  ;;  %v1422_v17 = vsel %vm1421_vm9, %v2187_v54, %v1418_v12  ;;  %vm1435_vm11 = vweird.f32 %v2191_v9 }
 0x277   : > { %2194 = vrcp.f32 %v3040_v11  ;;  %v1427_v18 = vsel %vm1424_vm10, %v1426_v10, %v1422_v17  ;;  %v740_v24 = vadd.f32 %v739_v15, %v626_v14  ;;  %vm1436_vm13 = vmor %vm1434_vm12, %vm1435_vm11  ;;  %v1455_v43 = vand.u32 2147483648, %v3040_v11 }
 0x278   : > { %v1431_v19 = vsub.f32 1.0, %v1430_v16  ;;  %1696 = vperm.xlu1 %2097, %v1427_v18   ;;  %v1453_v45 = vand.u32 2147483647, %v3040_v11  ;;  %vm1449_vm1 = vweird.f32 %v3040_v11 }
 0x279   : > { %v962_v20 = vpop.f32.mrf.mxu3  ;;  %v853_v33 = vadd.f32 %v852_v6, %v740_v24  ;;  %v1456_v53 = vor.u32 1.1754944e-38, %v1455_v43 }
 0x27a   : > { %v963_v23 = vadd.f32 %v962_v20, %v850_v13  ;;  %v1432_v25 = vmul.f32 %v2191_v9, %v1431_v19  ;;  %v855_v26 = vpop.f32.mrf.mxu2  ;;  %vm1454_vm3 = vcmp.eq.f32.partialorder %v1453_v45, 8.507059e+37 }
 0x27c   : > { %v2193_v27 = vpop.eup %2192  ;;  %v2042_v28 = vmul.f32 -1.442695, %v963_v23  ;;  %v1433_v29 = vadd.f32 %v2191_v9, %v1432_v25 }
 0x27d   : > { %v2195_v30 = vpop.eup %2194  ;;  %v1105_v31 = vadd.f32 1.0, %v2193_v27 }
 0x27e   : > { %2196 = vpow2.f32 %v2042_v28  ;;  %v1437_v34 = vsel %vm1436_vm13, %v2191_v9, %v1433_v29  ;;  %v629_v35 = vpop.f32.mrf.mxu0  ;;  %v742_v36 = vpop.f32.mrf.mxu1  ;;  %v1445_v38 = vmul.f32 %v2195_v30, %v3040_v11  ;;  %vm1450_vm15 = vweird.f32 %v2195_v30 }
 0x27f   : > { %2198 = vrcp.f32 %v1105_v31  ;;  %v1442_v37 = vsel %vm1439_vm14, %v1441_v32, %v1437_v34  ;;  %v743_v42 = vadd.f32 %v742_v36, %v629_v35  ;;  %vm1451_vm2 = vmor %vm1449_vm1, %vm1450_vm15  ;;  %v1468_v61 = vand.u32 2147483647, %v1105_v31 }
 0x280   : > { %1701 = vperm.xlu0 %2099, %v1442_v37   ;;  %v1446_v40 = vsub.f32 1.0, %v1445_v38  ;;  %v1470_v62 = vand.u32 2147483648, %v1105_v31  ;;  %vm1464_vm5 = vweird.f32 %v1105_v31 }
 0x281   : > { %v965_v39 = vpop.f32.mrf.mxu3  ;;  %v856_v52 = vadd.f32 %v855_v26, %v743_v42  ;;  %vm1469_vm7 = vcmp.eq.f32.partialorder %v1468_v61, 8.507059e+37 }
 0x282   : > { %v966_v41 = vadd.f32 %v965_v39, %v853_v33  ;;  %v1447_v44 = vmul.f32 %v2195_v30, %v1446_v40  ;;  %v858_v46 = vpop.f32.mrf.mxu2  ;;  %v1471_v7 = vor.u32 1.1754944e-38, %v1470_v62 }
 0x284   : > { %v2197_v47 = vpop.eup %2196  ;;  %v2043_v48 = vmul.f32 -1.442695, %v966_v41  ;;  %v1448_v51 = vadd.f32 %v2195_v30, %v1447_v44 }
 0x285   : > { %v2199_v49 = vpop.eup %2198  ;;  %v3047_v50 = vadd.f32 1.0, %v2197_v47 }
 0x286   : > { %2200 = vpow2.f32 %v2043_v48  ;;  %v632_v54 = vpop.f32.mrf.mxu0  ;;  %v745_v55 = vpop.f32.mrf.mxu1  ;;  %v1460_v56 = vmul.f32 %v2199_v49, %v1105_v31  ;;  %v1452_v57 = vsel %vm1451_vm2, %v2195_v30, %v1448_v51  ;;  %vm1465_vm4 = vweird.f32 %v2199_v49 }
 0x287   : > { %2202 = vrcp.f32 %v3047_v50  ;;  %v1457_v58 = vsel %vm1454_vm3, %v1456_v53, %v1452_v57  ;;  %v746_v0 = vadd.f32 %v745_v55, %v632_v54  ;;  %vm1466_vm6 = vmor %vm1464_vm5, %vm1465_vm4  ;;  %v1485_v19 = vand.u32 2147483648, %v3047_v50 }
 0x288   : > { %v1461_v59 = vsub.f32 1.0, %v1460_v56  ;;  %1706 = vperm.xlu2 %2098, %v1457_v58   ;;  %v1483_v21 = vand.u32 2147483647, %v3047_v50  ;;  %vm1479_vm9 = vweird.f32 %v3047_v50 }
 0x289   : > { %v968_v60 = vpop.f32.mrf.mxu3  ;;  %v859_v9 = vadd.f32 %v858_v46, %v746_v0  ;;  %v1486_v28 = vor.u32 1.1754944e-38, %v1485_v19 }
 0x28a   : > { %v969_v63 = vadd.f32 %v968_v60, %v856_v52  ;;  %v1462_v1 = vmul.f32 %v2199_v49, %v1461_v59  ;;  %v861_v8 = vpop.f32.mrf.mxu2  ;;  %vm1484_vm11 = vcmp.eq.f32.partialorder %v1483_v21, 8.507059e+37 }
 0x28c   : > { %v2201_v2 = vpop.eup %2200  ;;  %v2044_v3 = vmul.f32 -1.442695, %v969_v63  ;;  %v1463_v4 = vadd.f32 %v2199_v49, %v1462_v1 }
 0x28d   : > { %v2203_v5 = vpop.eup %2202  ;;  %v1107_v6 = vadd.f32 1.0, %v2201_v2 }
 0x28e   : > { %2204 = vpow2.f32 %v2044_v3  ;;  %v1467_v11 = vsel %vm1466_vm6, %v2199_v49, %v1463_v4  ;;  %v635_v12 = vpop.f32.mrf.mxu0  ;;  %v748_v13 = vpop.f32.mrf.mxu1  ;;  %v1475_v14 = vmul.f32 %v2203_v5, %v3047_v50  ;;  %vm1480_vm8 = vweird.f32 %v2203_v5 }
 0x28f   : > { %2206 = vrcp.f32 %v1107_v6  ;;  %v1472_v10 = vsel %vm1469_vm7, %v1471_v7, %v1467_v11  ;;  %v749_v18 = vadd.f32 %v748_v13, %v635_v12  ;;  %vm1481_vm10 = vmor %vm1479_vm9, %vm1480_vm8  ;;  %v1498_v37 = vand.u32 2147483647, %v1107_v6 }
 0x290   : > { %1711 = vperm.xlu1 %2097, %v1472_v10   ;;  %v1476_v16 = vsub.f32 1.0, %v1475_v14  ;;  %v1500_v38 = vand.u32 2147483648, %v1107_v6  ;;  %vm1494_vm13 = vweird.f32 %v1107_v6 }
 0x291   : > { %v971_v15 = vpop.f32.mrf.mxu3  ;;  %v862_v27 = vadd.f32 %v861_v8, %v749_v18  ;;  %vm1499_vm15 = vcmp.eq.f32.partialorder %v1498_v37, 8.507059e+37 }
 0x292   : > { %v972_v17 = vadd.f32 %v971_v15, %v859_v9  ;;  %v1477_v20 = vmul.f32 %v2203_v5, %v1476_v16  ;;  %v864_v33 = vpop.f32.mrf.mxu2  ;;  %v1501_v47 = vor.u32 1.1754944e-38, %v1500_v38 }
 0x294   : > { %v2205_v22 = vpop.eup %2204  ;;  %v2045_v23 = vmul.f32 -1.442695, %v972_v17  ;;  %v1478_v26 = vadd.f32 %v2203_v5, %v1477_v20 }
 0x295   : > { %v2207_v24 = vpop.eup %2206  ;;  %v3054_v25 = vadd.f32 1.0, %v2205_v22 }
 0x296   : > { %2208 = vpow2.f32 %v2045_v23  ;;  %v638_v29 = vpop.f32.mrf.mxu0  ;;  %v751_v30 = vpop.f32.mrf.mxu1  ;;  %v1490_v31 = vmul.f32 %v2207_v24, %v1107_v6  ;;  %v1482_v32 = vsel %vm1481_vm10, %v2203_v5, %v1478_v26  ;;  %vm1495_vm12 = vweird.f32 %v2207_v24 }
 0x297   : > { %2210 = vrcp.f32 %v3054_v25  ;;  %v1487_v34 = vsel %vm1484_vm11, %v1486_v28, %v1482_v32  ;;  %v752_v40 = vadd.f32 %v751_v30, %v638_v29  ;;  %vm1496_vm14 = vmor %vm1494_vm13, %vm1495_vm12  ;;  %v1513_v57 = vand.u32 2147483647, %v3054_v25 }
 0x298   : > { %v1491_v35 = vsub.f32 1.0, %v1490_v31  ;;  %1716 = vperm.xlu0 %2099, %v1487_v34   ;;  %v1515_v58 = vand.u32 2147483648, %v3054_v25  ;;  %vm1509_vm2 = vweird.f32 %v3054_v25 }
 0x299   : > { %v974_v36 = vpop.f32.mrf.mxu3  ;;  %v865_v48 = vadd.f32 %v864_v33, %v752_v40  ;;  %vm1514_vm4 = vcmp.eq.f32.partialorder %v1513_v57, 8.507059e+37 }
 0x29a   : > { %v975_v39 = vadd.f32 %v974_v36, %v862_v27  ;;  %v1492_v41 = vmul.f32 %v2207_v24, %v1491_v35  ;;  %v867_v56 = vpop.f32.mrf.mxu2  ;;  %v1516_v3 = vor.u32 1.1754944e-38, %v1515_v58 }
 0x29c   : > { %v2209_v42 = vpop.eup %2208  ;;  %v2046_v43 = vmul.f32 -1.442695, %v975_v39  ;;  %v1493_v44 = vadd.f32 %v2207_v24, %v1492_v41 }
 0x29d   : > { %v2211_v45 = vpop.eup %2210  ;;  %v3058_v46 = vadd.f32 1.0, %v2209_v42 }
 0x29e   : > { %2212 = vpow2.f32 %v2046_v43  ;;  %v1497_v49 = vsel %vm1496_vm14, %v2207_v24, %v1493_v44  ;;  %v641_v50 = vpop.f32.mrf.mxu0  ;;  %v754_v51 = vpop.f32.mrf.mxu1  ;;  %v1505_v52 = vmul.f32 %v2211_v45, %v3054_v25  ;;  %vm1510_vm1 = vweird.f32 %v2211_v45 }
 0x29f   : > { %2214 = vrcp.f32 %v3058_v46  ;;  %v1502_v53 = vsel %vm1499_vm15, %v1501_v47, %v1497_v49  ;;  %v755_v60 = vadd.f32 %v754_v51, %v641_v50  ;;  %vm1511_vm3 = vmor %vm1509_vm2, %vm1510_vm1  ;;  %v1530_v14 = vand.u32 2147483648, %v3058_v46 }
 0x2a0   : > { %1721 = vperm.xlu2 %2098, %v1502_v53   ;;  %v1506_v54 = vsub.f32 1.0, %v1505_v52  ;;  %v1528_v17 = vand.u32 2147483647, %v3058_v46  ;;  %vm1524_vm6 = vweird.f32 %v3058_v46 }
 0x2a1   : > { %v977_v55 = vpop.f32.mrf.mxu3  ;;  %v868_v4 = vadd.f32 %v867_v56, %v755_v60  ;;  %v1531_v24 = vor.u32 1.1754944e-38, %v1530_v14  ;;  %v2232_v14 = vld [vmem:[%s2399_s25] sm:$0xff] }
 0x2a2   : > { %v978_v59 = vadd.f32 %v977_v55, %v865_v48  ;;  %v1507_v61 = vmul.f32 %v2211_v45, %v1506_v54  ;;  %v870_v15 = vpop.f32.mrf.mxu2  ;;  %vm1529_vm8 = vcmp.eq.f32.partialorder %v1528_v17, 8.507059e+37  ;;  %v2233_v17 = vld [vmem:[%s2399_s25 + $0x8] sm:$0xff] }
 0x2a4   : > { %v2213_v62 = vpop.eup %2212  ;;  %v2047_v63 = vmul.f32 -1.442695, %v978_v59  ;;  %v1508_v0 = vadd.f32 %v2211_v45, %v1507_v61 }
 0x2a5   : > { %v2215_v1 = vpop.eup %2214  ;;  %v1110_v2 = vadd.f32 1.0, %v2213_v62 }
 0x2a6   : > { %2216 = vpow2.f32 %v2047_v63  ;;  %v1512_v5 = vsel %vm1511_vm3, %v2211_v45, %v1508_v0  ;;  %v644_v7 = vpop.f32.mrf.mxu0  ;;  %v757_v8 = vpop.f32.mrf.mxu1  ;;  %v1520_v9 = vmul.f32 %v2215_v1, %v3058_v46  ;;  %vm1525_vm5 = vweird.f32 %v2215_v1 }
 0x2a7   : > { %2218 = vrcp.f32 %v1110_v2  ;;  %v1517_v6 = vsel %vm1514_vm4, %v1516_v3, %v1512_v5  ;;  %v758_v10 = vadd.f32 %v757_v8, %v644_v7  ;;  %vm1526_vm7 = vmor %vm1524_vm6, %vm1525_vm5  ;;  %v1545_v30 = vand.u32 2147483648, %v1110_v2 }
 0x2a8   : > { %1726 = vperm.xlu1 %2097, %v1517_v6   ;;  %v1521_v12 = vsub.f32 1.0, %v1520_v9  ;;  %v1543_v33 = vand.u32 2147483647, %v1110_v2  ;;  %vm1539_vm10 = vweird.f32 %v1110_v2  ;;  %v1602_v9 = vpop.permute.xlu2 %1601 }
 0x2a9   : > { %v980_v11 = vpop.f32.mrf.mxu3  ;;  %v871_v23 = vadd.f32 %v870_v15, %v758_v10  ;;  %v1546_v39 = vor.u32 1.1754944e-38, %v1545_v30 }
 0x2aa   : > { %v981_v13 = vadd.f32 %v980_v11, %v868_v4  ;;  %v1522_v16 = vmul.f32 %v2215_v1, %v1521_v12  ;;  %vm1544_vm12 = vcmp.eq.f32.partialorder %v1543_v33, 8.507059e+37  ;;  %v1597_v12 = vpop.permute.xlu1 %1596 }
 0x2ab   : > { %v1754_v15 = vmul.f32 %v2232_v14, %v1597_v12 }
 0x2ac   : > { %v2217_v18 = vpop.eup %2216  ;;  %v2048_v19 = vmul.f32 -1.442695, %v981_v13  ;;  %v1523_v22 = vadd.f32 %v2215_v1, %v1522_v16  ;;  %v1607_v13 = vpop.permute.xlu0 %1606 }
 0x2ad   : > { %v2219_v20 = vpop.eup %2218  ;;  %v1111_v21 = vadd.f32 1.0, %v2217_v18  ;;  %v1755_v18 = vmul.f32 %v2233_v17, %v1602_v9 }
 0x2ae   : > { %2220 = vpow2.f32 %v2048_v19  ;;  %v1535_v25 = vmul.f32 %v2219_v20, %v1110_v2  ;;  %v1527_v26 = vsel %vm1526_vm7, %v2215_v1, %v1523_v22  ;;  %vm1540_vm9 = vweird.f32 %v2219_v20  ;;  %v2234_v19 = vld [vmem:[%s2399_s25 + $0x10] sm:$0xff] }
 0x2af   : > { %2222 = vrcp.f32 %v1111_v21  ;;  %v1532_v27 = vsel %vm1529_vm8, %v1531_v24, %v1527_v26  ;;  %vm1541_vm11 = vmor %vm1539_vm10, %vm1540_vm9  ;;  %v1560_v44 = vand.u32 2147483648, %v1111_v21  ;;  %v1558_v46 = vand.u32 2147483647, %v1111_v21  ;;  %v2235_v26 = vld [vmem:[%s2399_s25 + $0x18] sm:$0xff] }
 0x2b0   : > { %v1536_v28 = vsub.f32 1.0, %v1535_v25  ;;  %1731 = vperm.xlu0 %2099, %v1532_v27   ;;  %vm1554_vm14 = vweird.f32 %v1111_v21  ;;  %v1612_v11 = vpop.permute.xlu2 %1611  ;;  %v1787_v22 = vsel %vm174_vm0, %v1755_v18, 0.0 }
 0x2b1   : > { %v983_v29 = vpop.f32.mrf.mxu3  ;;  %v1561_v51 = vor.u32 1.1754944e-38, %v1560_v44  ;;  %vm1559_vm1 = vcmp.eq.f32.partialorder %v1558_v46, 8.507059e+37  ;;  %v1757_v27 = vmul.f32 %v2235_v26, %v1612_v11 }
 0x2b2   : > { %v984_v31 = vadd.f32 %v983_v29, %v871_v23  ;;  %v1537_v32 = vmul.f32 %v2219_v20, %v1536_v28  ;;  %v1617_v16 = vpop.permute.xlu1 %1616  ;;  %v2236_v28 = vld [vmem:[%s2399_s25 + $0x20] sm:$0xff] }
 0x2b3   : > { %v1758_v29 = vmul.f32 %v2236_v28, %v1617_v16 }
 0x2b4   : > { %v2221_v34 = vpop.eup %2220  ;;  %v2049_v35 = vmul.f32 -1.442695, %v984_v31  ;;  %v1538_v36 = vadd.f32 %v2219_v20, %v1537_v32  ;;  %v1791_v32 = vsel %vm174_vm0, %v1757_v27, 0.0 }
 0x2b5   : > { %v2223_v37 = vpop.eup %2222  ;;  %v1112_v38 = vadd.f32 1.0, %v2221_v34  ;;  %v1793_v33 = vsel %vm174_vm0, %v1758_v29, 0.0 }
 0x2b6   : > { %2224 = vpow2.f32 %v2049_v35  ;;  %v1542_v40 = vsel %vm1541_vm11, %v2219_v20, %v1538_v36  ;;  %v1550_v42 = vmul.f32 %v2223_v37, %v1111_v21  ;;  %vm1555_vm13 = vweird.f32 %v2223_v37  ;;  %v2237_v35 = vld [vmem:[%s2399_s25 + $0x28] sm:$0xff] }
 0x2b7   : > { %2226 = vrcp.f32 %v1112_v38  ;;  %v1547_v41 = vsel %vm1544_vm12, %v1546_v39, %v1542_v40  ;;  %vm1556_vm15 = vmor %vm1554_vm14, %vm1555_vm13  ;;  %v1575_v56 = vand.u32 2147483648, %v1112_v38  ;;  %v1573_v58 = vand.u32 2147483647, %v1112_v38 }
 0x2b8   : > { %1736 = vperm.xlu2 %2098, %v1547_v41   ;;  %v1551_v43 = vsub.f32 1.0, %v1550_v42  ;;  %vm1569_vm3 = vweird.f32 %v1112_v38  ;;  %v1622_v10 = vpop.permute.xlu2 %1621  ;;  %v1756_v20 = vmul.f32 %v2234_v19, %v1607_v13  ;;  %v1786_v21 = vsel %vm174_vm0, %v1754_v15, 0.0  ;;  %v2244_v13 = vld [vmem:[%s2399_s25 + $0x60] sm:$0xff] }
 0x2b9   : > { %v1576_v61 = vor.u32 1.1754944e-38, %v1575_v56  ;;  %vm1574_vm5 = vcmp.eq.f32.partialorder %v1573_v58, 8.507059e+37  ;;  %v1788_v24 = vadd.f32 %v1787_v22, %v1786_v21  ;;  %v1759_v36 = vmul.f32 %v2237_v35, %v1622_v10  ;;  %v2241_v56 = vld [vmem:[%s2399_s25 + $0x48] sm:$0xff] }
 0x2ba   : > { %v1552_v45 = vmul.f32 %v2223_v37, %v1551_v43  ;;  %v1789_v23 = vsel %vm174_vm0, %v1756_v20, 0.0  ;;  %v1627_v31 = vpop.permute.xlu1 %1626  ;;  %v1863_v41 = vsel %vm174_vm0, %v1754_v15, -inf  ;;  %v1864_v43 = vsel %vm174_vm0, %v1755_v18, -inf }
 0x2bb   : > { %v1790_v30 = vadd.f32 %v1789_v23, %v1788_v24  ;;  %v1795_v44 = vsel %vm174_vm0, %v1759_v36, 0.0  ;;  %v1870_v46 = vmax.f32 %v1864_v43, %v1863_v41  ;;  %vm1934_vm11 = vcmask 254976  }
 0x2bc   : > { %v2225_v47 = vpop.eup %2224  ;;  %v1553_v50 = vadd.f32 %v2223_v37, %v1552_v45 }
 0x2bd   : > { %v2227_v48 = vpop.eup %2226  ;;  %v1113_v49 = vadd.f32 1.0, %v2225_v47  ;;  %v1792_v34 = vadd.f32 %v1791_v32, %v1790_v30 }
 0x2be   : > { %v1565_v52 = vmul.f32 %v2227_v48, %v1112_v38  ;;  %v1557_v53 = vsel %vm1556_vm15, %v2223_v37, %v1553_v50  ;;  %vm1570_vm2 = vweird.f32 %v2227_v48  ;;  %v2238_v37 = vld [vmem:[%s2399_s25 + $0x30] sm:$0xff] }
 0x2bf   : > { %2228 = vrcp.f32 %v1113_v49  ;;  %v1562_v54 = vsel %vm1559_vm1, %v1561_v51, %v1557_v53  ;;  %vm1571_vm4 = vmor %vm1569_vm3, %vm1570_vm2  ;;  %v1590_v1 = vand.u32 2147483648, %v1113_v49  ;;  %vm1584_vm6 = vweird.f32 %v1113_v49  ;;  %v2240_v51 = vld [vmem:[%s2399_s25 + $0x40] sm:$0xff] }
 0x2c0   : > { %v1566_v55 = vsub.f32 1.0, %v1565_v52  ;;  %1741 = vperm.xlu1 %2097, %v1562_v54   ;;  %v1588_v3 = vand.u32 2147483647, %v1113_v49  ;;  %v1632_v25 = vpop.permute.xlu2 %1631  ;;  %v1760_v38 = vmul.f32 %v2238_v37, %v1627_v31  ;;  %v1794_v39 = vadd.f32 %v1793_v33, %v1792_v34  ;;  %v2247_v34 = vld [vmem:[%s2399_s25 + $0x78] sm:$0xff] }
 0x2c1   : > { %v1591_v5 = vor.u32 1.1754944e-38, %v1590_v1  ;;  %v1866_v54 = vsel %vm174_vm0, %v1757_v27, -inf  ;;  %v2245_v27 = vld [vmem:[%s2399_s25 + $0x68] sm:$0xff] }
 0x2c2   : > { %v1567_v57 = vmul.f32 %v2227_v48, %v1566_v55  ;;  %vm1589_vm9 = vcmp.eq.f32.partialorder %v1588_v3, 8.507059e+37  ;;  %v1637_v42 = vpop.permute.xlu1 %1636  ;;  %v1797_v45 = vsel %vm174_vm0, %v1760_v38, 0.0  ;;  %v1796_v47 = vadd.f32 %v1795_v44, %v1794_v39 }
 0x2c3   : > { %v1762_v52 = vmul.f32 %v2240_v51, %v1637_v42  ;;  %v1865_v55 = vsel %vm174_vm0, %v1756_v20, -inf  ;;  %v1868_v58 = vmax.f32 %v1866_v54, %v1870_v46  ;;  %v1871_v21 = vsel %vm174_vm0, %v1760_v38, -inf }
 0x2c4   : > { %v1568_v59 = vadd.f32 %v2227_v48, %v1567_v57  ;;  %v1798_v53 = vadd.f32 %v1797_v45, %v1796_v47 }
 0x2c5   : > { %v2229_v60 = vpop.eup %2228  ;;  %v1875_v33 = vsel %vm174_vm0, %v1762_v52, -inf }
 0x2c6   : > { %v1572_v62 = vsel %vm1571_vm4, %v2227_v48, %v1568_v59  ;;  %v1580_v63 = vmul.f32 %v2229_v60, %v1113_v49  ;;  %vm1585_vm7 = vweird.f32 %v2229_v60  ;;  %v1642_v48 = vpop.permute.xlu0 %1641  ;;  %v2239_v49 = vld [vmem:[%s2399_s25 + $0x38] sm:$0xff] }
 0x2c7   : > { %v1577_v0 = vsel %vm1574_vm5, %v1576_v61, %v1572_v62  ;;  %vm1586_vm8 = vmor %vm1584_vm6, %vm1585_vm7  ;;  %v1761_v50 = vmul.f32 %v2239_v49, %v1632_v25  ;;  %v1763_v57 = vmul.f32 %v2241_v56, %v1642_v48  ;;  %v1801_v61 = vsel %vm174_vm0, %v1762_v52, 0.0  ;;  %v2249_v52 = vld [vmem:[%s2399_s25 + $0x88] sm:$0xff] }
 0x2c8   : > { %1746 = vperm.xlu0 %2099, %v1577_v0   ;;  %v1581_v2 = vsub.f32 1.0, %v1580_v63  ;;  %v1647_v40 = vpop.permute.xlu2 %1646  ;;  %v1874_v62 = vmax.f32 %v1865_v55, %v1868_v58 }
 0x2c9   : > { %v1803_v1 = vsel %vm174_vm0, %v1763_v57, 0.0  ;;  %v1873_v20 = vsel %vm174_vm0, %v1761_v50, -inf  ;;  %v1877_v38 = vsel %vm174_vm0, %v1763_v57, -inf  ;;  %v2250_v57 = vld [vmem:[%s2399_s25 + $0x90] sm:$0xff] }
 0x2ca   : > { %v1582_v4 = vmul.f32 %v2229_v60, %v1581_v2  ;;  %v1652_v0 = vpop.permute.xlu1 %1651 }
 0x2cc   : > { %v1583_v6 = vadd.f32 %v2229_v60, %v1582_v4  ;;  %v1869_v4 = vsel %vm174_vm0, %v1759_v36, -inf }
 0x2cd   : > { %v1872_v11 = vmax.f32 %v1869_v4, %v1874_v62  ;;  %v2251_v4 = vld [vmem:[%s2399_s25 + $0x98] sm:$0xff] }
 0x2ce   : > { %v1587_v7 = vsel %vm1586_vm8, %v2229_v60, %v1583_v6  ;;  %v1799_v60 = vsel %vm174_vm0, %v1761_v50, 0.0  ;;  %v1657_v3 = vpop.permute.xlu0 %1656  ;;  %v2242_v6 = vld [vmem:[%s2399_s25 + $0x50] sm:$0xff]  ;;  %v2248_v50 = vld [vmem:[%s2399_s25 + $0x80] sm:$0xff] }
 0x2cf   : > { %v1592_v8 = vsel %vm1589_vm9, %v1591_v5, %v1587_v7  ;;  %v1800_v63 = vadd.f32 %v1799_v60, %v1798_v53  ;;  %v1867_v5 = vsel %vm174_vm0, %v1758_v29, -inf  ;;  %v1764_v7 = vmul.f32 %v2242_v6, %v1647_v40  ;;  %v2246_v29 = vld [vmem:[%s2399_s25 + $0x70] sm:$0xff] }
 0x2d0   : > { %1751 = vperm.xlu2 %2098, %v1592_v8   ;;  %v1662_v59 = vpop.permute.xlu2 %1661  ;;  %v2243_v8 = vld [vmem:[%s2399_s25 + $0x58] sm:$0xff]  ;;  %v1766_v10 = vmul.f32 %v2244_v13, %v1657_v3  ;;  %v1880_v14 = vmax.f32 %v1872_v11, %v1867_v5 }
 0x2d1   : > { %v1802_v2 = vadd.f32 %v1801_v61, %v1800_v63  ;;  %v1765_v9 = vmul.f32 %v2243_v8, %v1652_v0  ;;  %v1805_v16 = vsel %vm174_vm0, %v1764_v7, 0.0  ;;  %v1879_v26 = vsel %vm174_vm0, %v1764_v7, -inf }
 0x2d2   : > { %v1667_v19 = vpop.permute.xlu1 %1666  ;;  %v1809_v22 = vsel %vm174_vm0, %v1766_v10, 0.0  ;;  %v1876_v23 = vmax.f32 %v1873_v20, %v1880_v14  ;;  %v1767_v28 = vmul.f32 %v2245_v27, %v1662_v59  ;;  %v1883_v56 = vsel %vm174_vm0, %v1766_v10, -inf }
 0x2d3   : > { %v1804_v12 = vadd.f32 %v1803_v1, %v1802_v2  ;;  %v1807_v17 = vsel %vm174_vm0, %v1765_v9, 0.0  ;;  %v1768_v30 = vmul.f32 %v2246_v29, %v1667_v19  ;;  %v1881_v49 = vsel %vm174_vm0, %v1765_v9, -inf }
 0x2d4   : > { %v1878_v31 = vmax.f32 %v1871_v21, %v1876_v23  ;;  %v1811_v39 = vsel %vm174_vm0, %v1767_v28, 0.0  ;;  %v1885_v44 = vsel %vm174_vm0, %v1767_v28, -inf }
 0x2d5   : > { %v1806_v18 = vadd.f32 %v1805_v16, %v1804_v12  ;;  %v1813_v40 = vsel %vm174_vm0, %v1768_v30, 0.0  ;;  %v1887_v3 = vsel %vm174_vm0, %v1768_v30, -inf  ;;  %v2252_v12 = vld [vmem:[%s2399_s25 + $0xa0] sm:$0xff]  ;;  %v2253_v16 = vld [vmem:[%s2399_s25 + $0xa8] sm:$0xff] }
 0x2d6   : > { %v1672_v25 = vpop.permute.xlu0 %1671  ;;  %v1886_v36 = vmax.f32 %v1878_v31, %v1879_v26 }
 0x2d7   : > { %v1808_v24 = vadd.f32 %v1807_v17, %v1806_v18  ;;  %v1769_v35 = vmul.f32 %v2247_v34, %v1672_v25  ;;  %v2255_v34 = vld [vmem:[%s2399_s25 + $0xb8] sm:$0xff] }
 0x2d8   : > { %v1677_v15 = vpop.permute.xlu2 %1676  ;;  %v1882_v41 = vmax.f32 %v1875_v33, %v1886_v36 }
 0x2d9   : > { %v1810_v32 = vadd.f32 %v1809_v22, %v1808_v24  ;;  %v1815_v45 = vsel %vm174_vm0, %v1769_v35, 0.0  ;;  %v1770_v51 = vmul.f32 %v2248_v50, %v1677_v15  ;;  %v1889_v11 = vsel %vm174_vm0, %v1769_v35, -inf  ;;  %v2254_v22 = vld [vmem:[%s2399_s25 + $0xb0] sm:$0xff] }
 0x2da   : > { %v1682_v43 = vpop.permute.xlu1 %1681  ;;  %v1884_v46 = vmax.f32 %v1877_v38, %v1882_v41  ;;  %v2257_v41 = vld [vmem:[%s2399_s25 + $0xc0] sm:$0xff] }
 0x2db   : > { %v1812_v42 = vadd.f32 %v1811_v39, %v1810_v32  ;;  %v1771_v53 = vmul.f32 %v2249_v52, %v1682_v43  ;;  %v1817_v61 = vsel %vm174_vm0, %v1770_v51, 0.0  ;;  %v1891_v62 = vsel %vm174_vm0, %v1770_v51, -inf  ;;  %v2256_v39 = vld [vmem:[%s2399_s25 + $0xc8] sm:$0xff] }
 0x2dc   : > { %v1892_v54 = vmax.f32 %v1884_v46, %v1885_v44 }
 0x2dd   : > { %v1814_v47 = vadd.f32 %v1813_v40, %v1812_v42  ;;  %v1819_v63 = vsel %vm174_vm0, %v1771_v53, 0.0  ;;  %v1893_v21 = vsel %vm174_vm0, %v1771_v53, -inf }
 0x2de   : > { %v1687_v48 = vpop.permute.xlu0 %1686  ;;  %v1888_v59 = vmax.f32 %v1881_v49, %v1892_v54 }
 0x2df   : > { %v1816_v55 = vadd.f32 %v1815_v45, %v1814_v47  ;;  %v1772_v58 = vmul.f32 %v2250_v57, %v1687_v48  ;;  %v2258_v57 = vld [vmem:[%s2399_s25 + $0xe0] sm:$0xff] }
 0x2e0   : > { %v1692_v37 = vpop.permute.xlu2 %1691  ;;  %v1890_v0 = vmax.f32 %v1883_v56, %v1888_v59  ;;  %v2259_v59 = vld [vmem:[%s2399_s25 + $0xd0] sm:$0xff] }
 0x2e1   : > { %v1818_v1 = vadd.f32 %v1817_v61, %v1816_v55  ;;  %v1773_v5 = vmul.f32 %v2251_v4, %v1692_v37  ;;  %v1821_v6 = vsel %vm174_vm0, %v1772_v58, 0.0  ;;  %v1895_v28 = vsel %vm174_vm0, %v1772_v58, -inf }
 0x2e2   : > { %v1898_v7 = vmax.f32 %v1890_v0, %v1891_v62  ;;  %v2260_v0 = vld [vmem:[%s2399_s25 + $0xd8] sm:$0xff] }
 0x2e3   : > { %v1820_v8 = vadd.f32 %v1819_v63, %v1818_v1  ;;  %v1897_v15 = vsel %vm174_vm0, %v1773_v5, -inf  ;;  %v1823_v20 = vsel %vm174_vm0, %v1773_v5, 0.0 }
 0x2e4   : > { %v1894_v10 = vmax.f32 %v1887_v3, %v1898_v7 }
 0x2e5   : > { %v1822_v14 = vadd.f32 %v1821_v6, %v1820_v8 }
 0x2e6   : > { %v1896_v18 = vmax.f32 %v1889_v11, %v1894_v10 }
 0x2e7   : > { %v1824_v26 = vadd.f32 %v1823_v20, %v1822_v14 }
 0x2e8   : > { %v1707_v60 = vpop.permute.xlu2 %1706  ;;  %v1904_v25 = vmax.f32 %v1896_v18, %v1897_v15  ;;  %v2262_v18 = vld [vmem:[%s2399_s25 + $0xe8] sm:$0xff] }
 0x2e9   : > { %v1776_v23 = vmul.f32 %v2254_v22, %v1707_v60 }
 0x2ea   : > { %v1697_v2 = vpop.permute.xlu1 %1696  ;;  %v1900_v30 = vmax.f32 %v1893_v21, %v1904_v25 }
 0x2eb   : > { %v1774_v13 = vmul.f32 %v2252_v12, %v1697_v2  ;;  %v1903_v33 = vsel %vm174_vm0, %v1776_v23, -inf  ;;  %v1829_v45 = vsel %vm174_vm0, %v1776_v23, 0.0 }
 0x2ec   : > { %v1902_v36 = vmax.f32 %v1895_v28, %v1900_v30 }
 0x2ed   : > { %v1825_v24 = vsel %vm174_vm0, %v1774_v13, 0.0  ;;  %v1899_v38 = vsel %vm174_vm0, %v1774_v13, -inf  ;;  %v2261_v13 = vld [vmem:[%s2399_s25 + $0xf8] sm:$0xff] }
 0x2ee   : > { %v1826_v31 = vadd.f32 %v1825_v24, %v1824_v26  ;;  %v1910_v43 = vmax.f32 %v1902_v36, %v1903_v33 }
 0x2f0   : > { %v1906_v48 = vmax.f32 %v1899_v38, %v1910_v43 }
 0x2f2   : > { %v1702_v9 = vpop.permute.xlu0 %1701 }
 0x2f3   : > { %v1775_v17 = vmul.f32 %v2253_v16, %v1702_v9  ;;  %v2330_v9 = vmov 256.0  }
 0x2f4   : > { %2230 = vrcp.f32 %v2330_v9 }
 0x2f5   : > { %v1827_v29 = vsel %vm174_vm0, %v1775_v17, 0.0  ;;  %v1901_v46 = vsel %vm174_vm0, %v1775_v17, -inf }
 0x2f6   : > { %v1828_v37 = vadd.f32 %v1827_v29, %v1826_v31  ;;  %v1908_v53 = vmax.f32 %v1901_v46, %v1906_v48  ;;  %v2263_v31 = vld [vmem:[%s2399_s25 + $0xf0] sm:$0xff]  ;;  %s2015_s25 = sshll.u32 %s134_s30, 1 }
 0x2f7   : > { %s136_s7 = scalar_lea.vmem [#allocation2], %s2015_s25 }
 0x2f8   : > { %v1830_v49 = vadd.f32 %v1829_v45, %v1828_v37  ;;  %s1949_s8 = sshll.u32 %s136_s7, 4  ;;  %s1950_s8 = int_to_ptr.vmem [resolvable:$true] %s1949_s8 }
 0x2fa   : > { %v1722_v19 = vpop.permute.xlu2 %1721  ;;  %v2231_v23 = vpop.eup %2230 }
 0x2fb   : > { %v1779_v40 = vmul.f32 %v2256_v39, %v1722_v19  ;;  %v1856_v33 = vmul.f32 256.0, %v2231_v23  ;;  %vm1860_vm10 = vweird.f32 %v2231_v23 }
 0x2fd   : > { %v1909_v51 = vsel %vm174_vm0, %v1779_v40, -inf  ;;  %v1835_v4 = vsel %vm174_vm0, %v1779_v40, 0.0 }
 0x2fe   : > { %v1916_v61 = vmax.f32 %v1908_v53, %v1909_v51 }
 0x302   : > { %v1712_v27 = vpop.permute.xlu1 %1711 }
 0x303   : > { %v1777_v35 = vmul.f32 %v2255_v34, %v1712_v27 }
 0x305   : > { %v1831_v47 = vsel %vm174_vm0, %v1777_v35, 0.0  ;;  %v1905_v56 = vsel %vm174_vm0, %v1777_v35, -inf }
 0x306   : > { %v1832_v54 = vadd.f32 %v1831_v47, %v1830_v49  ;;  %v1912_v2 = vmax.f32 %v1905_v56, %v1916_v61 }
 0x30a   : > { %v1717_v32 = vpop.permute.xlu0 %1716 }
 0x30b   : > { %v1778_v42 = vmul.f32 %v2257_v41, %v1717_v32  ;;  %v1857_v41 = vsub.f32 1.0, %v1856_v33 }
 0x30d   : > { %v1833_v52 = vsel %vm174_vm0, %v1778_v42, 0.0  ;;  %v1907_v63 = vsel %vm174_vm0, %v1778_v42, -inf  ;;  %v1858_v46 = vmul.f32 %v2231_v23, %v1857_v41 }
 0x30e   : > { %v1834_v62 = vadd.f32 %v1833_v52, %v1832_v54  ;;  %v1914_v7 = vmax.f32 %v1907_v63, %v1912_v2 }
 0x30f   : > { %v1859_v51 = vadd.f32 %v2231_v23, %v1858_v46 }
 0x310   : > { %v1836_v8 = vadd.f32 %v1835_v4, %v1834_v62 }
 0x312   : > { %v1737_v44 = vpop.permute.xlu2 %1736 }
 0x313   : > { %v1782_v58 = vmul.f32 %v2258_v57, %v1737_v44 }
 0x315   : > { %v1915_v5 = vsel %vm174_vm0, %v1782_v58, -inf  ;;  %v1841_v25 = vsel %vm174_vm0, %v1782_v58, 0.0 }
 0x316   : > { %v1922_v15 = vmax.f32 %v1914_v7, %v1915_v5 }
 0x31a   : > { %v1727_v50 = vpop.permute.xlu1 %1726 }
 0x31b   : > { %v1780_v60 = vmul.f32 %v2259_v59, %v1727_v50 }
 0x31d   : > { %v1837_v6 = vsel %vm174_vm0, %v1780_v60, 0.0  ;;  %v1911_v11 = vsel %vm174_vm0, %v1780_v60, -inf }
 0x31e   : > { %v1838_v16 = vadd.f32 %v1837_v6, %v1836_v8  ;;  %v1918_v20 = vmax.f32 %v1911_v11, %v1922_v15 }
 0x322   : > { %v1732_v55 = vpop.permute.xlu0 %1731 }
 0x323   : > { %v1781_v1 = vmul.f32 %v2260_v0, %v1732_v55  ;;  %v1861_v55 = vsel %vm1860_vm10, %v2231_v23, %v1859_v51 }
 0x325   : > { %v1839_v12 = vsel %vm174_vm0, %v1781_v1, 0.0  ;;  %v1913_v17 = vsel %vm174_vm0, %v1781_v1, -inf }
 0x326   : > { %v1840_v21 = vadd.f32 %v1839_v12, %v1838_v16  ;;  %v1923_v24 = vmax.f32 %v1913_v17, %v1918_v20 }
 0x328   : > { %v1842_v29 = vadd.f32 %v1841_v25, %v1840_v21 }
 0x32a   : > { %v1752_v3 = vpop.permute.xlu2 %1751 }
 0x32b   : > { %v1785_v10 = vmul.f32 %v2261_v13, %v1752_v3 }
 0x32d   : > { %v1921_v22 = vsel %vm174_vm0, %v1785_v10, -inf  ;;  %v1847_v40 = vsel %vm174_vm0, %v1785_v10, 0.0 }
 0x32e   : > { %v1920_v28 = vmax.f32 %v1921_v22, %v1923_v24 }
 0x332   : > { %v1742_v14 = vpop.permute.xlu1 %1741 }
 0x333   : > { %v1783_v19 = vmul.f32 %v2262_v18, %v1742_v14 }
 0x335   : > { %v1843_v26 = vsel %vm174_vm0, %v1783_v19, 0.0  ;;  %v1917_v27 = vsel %vm174_vm0, %v1783_v19, -inf }
 0x336   : > { %v1844_v34 = vadd.f32 %v1843_v26, %v1842_v29  ;;  %v1924_v35 = vmax.f32 %v1920_v28, %v1917_v27 }
 0x33a   : > { %v1747_v30 = vpop.permute.xlu0 %1746 }
 0x33b   : > { %v1784_v32 = vmul.f32 %v2263_v31, %v1747_v30 }
 0x33d   : > { %v1845_v36 = vsel %vm174_vm0, %v1784_v32, 0.0  ;;  %v1919_v37 = vsel %vm174_vm0, %v1784_v32, -inf  ;;  %vm1932_vm0 = vcmask 1040384  }
 0x33e   : > { %v1846_v38 = vadd.f32 %v1845_v36, %v1844_v34  ;;  %v1925_v39 = vmax.f32 %v1919_v37, %v1924_v35 }
 0x340   : > { %v1848_v42 = vadd.f32 %v1847_v40, %v1846_v38  ;;  %v1926_v43 = vrot.slane %v1925_v39, 4 }
 0x342   : > { %v1849_v44 = vrot.slane %v1848_v42, 4  ;;  %v1927_v45 = vmax.f32 %v1925_v39, %v1926_v43 }
 0x344   : > { %v1850_v47 = vadd.f32 %v1849_v44, %v1848_v42  ;;  %v1928_v48 = vrot.slane %v1927_v45, 2 }
 0x346   : > { %v1851_v49 = vrot.slane %v1850_v47, 2  ;;  %v1929_v50 = vmax.f32 %v1927_v45, %v1928_v48 }
 0x348   : > { %v1852_v52 = vadd.f32 %v1851_v49, %v1850_v47  ;;  %v1930_v54 = vrot.slane %v1929_v50, 1 }
 0x34a   : > { %v1853_v53 = vrot.slane %v1852_v52, 1  ;;  %v1931_v58 = vmax.f32 %v1929_v50, %v1930_v54 }
 0x34c   : > { %v1854_v56 = vadd.f32 %v1853_v53, %v1852_v52 }
 0x34e   : > { %v1862_v57 = vmul.f32 %v1861_v55, %v1854_v56 }
 0x350   : > { %v1933_v59 = vsel %vm1932_vm0, %v1862_v57, %v1931_v58 }
 0x351   : > { %1935 = vst.msk [vmem:[%s136_s7] sm:$0x3] %vm1934_vm11, %v1933_v59 }
 0x352   : > { %2291 = shalt.err (!%p2288_p3)
}
 0x353   : > { %2055 = dma.vmem_to_hbm [thread:$0]  (%p2384_p5), %s1950_s8, 32, %s1952_s14, %s1937_s13  }
 0x354 PF: > { %p2061_p4 = scmp.ge.s32.totalorder %s2326_s12, 2  ;;  %s1963_s27 = sand.u32 1, %s2314_s9  }
 0x355   : > { %s1964_s28 = scalar_lea.sflag [#allocation3], %s1963_s27 }
 0x356   : > { %p2058_p7 = pnand %p2061_p4, %p2388_p6 }
 0x358   : > { %p2059_p8 = pneg %p2058_p7 }
 0x35a   : > { %2309 = dma.done.wait (%p2059_p8), %s1964_s28, 32  }
 0x35b   : > { %2311 = vsyncadd (%p2059_p8), %s1964_s28, 4294967264  ;;  %p12_p9 = scmp.ge.s32.totalorder %s2371_s15, 6   ;;  %s3202_s9 = smov %s2318_s10 }
 0x35c   : > { %s3203_s10 = smov %s2322_s11  ;;  %s3204_s11 = smov %s2382_s18 }
 0x35d   : > { %s3205_s12 = smov %s2371_s15  ;;  %14 = sbr.rel (!%p12_p9) target bundleno = 3 (0x3), region = 63 }
 0x362   :  { %1970 = vsyncpa [#allocation3], 1 }
 0x363   :  { %1972 = vsyncpa [#allocation3 + $0x1], 1 }

</bundles_post_ra>
